<compile_context>
chip_gen: v7x
topology: tpu7x:2x2x1
jax: 0.10.0
libtpu: 0.0.40
codegen_flags: <defaults>
</compile_context>

<pallas_src>
import math

import jax
import jax.numpy as jnp
from jax.experimental import pallas as pl
from jax.experimental.pallas import tpu as pltpu

NHEAD = 8
LN_EPS = 1e-5


def _layer_norm_f32(x, w, b):
    mu = jnp.mean(x, axis=-1, keepdims=True)
    var = jnp.mean((x - mu) ** 2, axis=-1, keepdims=True)
    return (x - mu) * jax.lax.rsqrt(var + LN_EPS) * w + b


def _softmax_lastdim(s):
    # stable softmax; denominator reciprocal goes to the EUP slot (approx=True)
    s = s - jnp.max(s, axis=-1, keepdims=True)
    p = jnp.exp(s)
    return p * pl.reciprocal(jnp.sum(p, axis=-1, keepdims=True), approx=True)


def make_coreblock_kernel(S, D, H, compute_dtype, attn_impl):
    Hd = D // H

    def to_cd(a):  # cast MXU feeds; identity in the f32 configuration
        return a if a.dtype == compute_dtype else a.astype(compute_dtype)

    def kernel(x_ref, mask_ref,
               win_t_ref, bin_ref, wo_t_ref, bo_ref, ln1w_ref, ln1b_ref,
               w1_t_ref, b1_ref, w2_t_ref, b2_ref, ln2w_ref, ln2b_ref,
               o_ref):
        bb = x_ref.shape[0]          # batch elements handled by this grid step (static)
        M = bb * S

        # Flatten (bb, S, D) -> (bb*S, D): every dense projection is one 2-D MXU matmul.
        # x stays f32 for the residual / LayerNorm path (PyTorch parity).
        x_f32 = x_ref[...].reshape(M, D)

        # ---- fused QKV projection (scale already folded into win_t/bin q-columns) ----
        qkv = jnp.dot(to_cd(x_f32), win_t_ref[...],
                      preferred_element_type=jnp.float32) + bin_ref[...]
        q = to_cd(qkv[:, :D])
        k = to_cd(qkv[:, D:2 * D])
        v = to_cd(qkv[:, 2 * D:])

        if attn_impl == "masked":
            # D <= 128: per-head feature masks on q and v only (masking k is redundant).
            # Scores: head-flattened masked q (bb, H*S, D) x unmasked k (bb, S, D) -- one
            # batched matmul, no H-times replication of k, no lane slicing / concat.
            mask = mask_ref[...]                                   # (1, H, 1, D)
            qm = q.reshape(bb, 1, S, D) * mask                     # (bb, H, S, D)
            vm = v.reshape(bb, 1, S, D) * mask
            kb = k.reshape(bb, S, D)
            s = jnp.einsum('bmd,bkd->bmk', qm.reshape(bb, H * S, D), kb,
                           preferred_element_type=jnp.float32)     # (bb, H*S, S)
            p = _softmax_lastdim(s)
            ctx = jnp.einsum('nqk,nkd->nqd',
                             to_cd(p).reshape(bb * H, S, S),
                             vm.reshape(bb * H, S, D),
                             preferred_element_type=jnp.float32)   # (bb*H, S, D)
            # Each ctx[n] is zero outside its head's Hd columns -> merge is a cheap sum.
            attn = jnp.sum(ctx.reshape(bb, H, S, D), axis=1).reshape(M, D)
        else:
            # D > 128: true head-split attention; the mask trick would cost D/Hd = H extra
            # MXU passes + VMEM per head at production d_model.
            # TODO(synk): flash/kv-tiled variant for long sequences (v7x VMEM headroom).
            def split_heads(t):                                    # (M, D) -> (bb*H, S, Hd)
                return t.reshape(bb, S, H, Hd).transpose(0, 2, 1, 3).reshape(bb * H, S, Hd)
            qh, kh, vh = split_heads(q), split_heads(k), split_heads(v)
            s = jnp.einsum('nqd,nkd->nqk', qh, kh,
                           preferred_element_type=jnp.float32)     # (bb*H, S, S)
            p = _softmax_lastdim(s)
            ctx = jnp.einsum('nqk,nkd->nqd', to_cd(p), vh,
                             preferred_element_type=jnp.float32)   # (bb*H, S, Hd)
            attn = ctx.reshape(bb, H, S, Hd).transpose(0, 2, 1, 3).reshape(M, D)

        # ---- output projection ----
        attn = jnp.dot(to_cd(attn), wo_t_ref[...],
                       preferred_element_type=jnp.float32) + bo_ref[...]

        # ---- residual + LayerNorm1 (f32 VPU/EUP math on every chip generation) ----
        y = _layer_norm_f32(x_f32 + attn, ln1w_ref[...], ln1b_ref[...])

        # ---- feed-forward (ReLU) ----
        h1 = jnp.dot(to_cd(y), w1_t_ref[...],
                     preferred_element_type=jnp.float32) + b1_ref[...]
        h1 = jnp.maximum(h1, 0.0)
        h2 = jnp.dot(to_cd(h1), w2_t_ref[...],
                     preferred_element_type=jnp.float32) + b2_ref[...]

        # ---- residual + LayerNorm2 ----
        z = _layer_norm_f32(y + h2, ln2w_ref[...], ln2b_ref[...])
        o_ref[...] = z.reshape(bb, S, D).astype(o_ref.dtype)

    return kernel


def _default_batch_block(B, S):
    """>=2 grid steps when possible (both v7x TCs + DMA/compute overlap), preferring
    bb*S >= 128 rows per step so the MXU stays fed (v5e 128x128, v6e/v7x 256x256)."""
    divisors = [d for d in range(1, B + 1) if B % d == 0]
    multi = [d for d in divisors if B // d >= 2]
    if not multi:
        return B
    fed = [d for d in multi if d * S >= 128]
    return max(fed) if fed else max(multi)


def coreblock_forward(x, params, *, batch_block=None, compute_dtype=jnp.float32,
                      attn_impl=None, vmem_limit_bytes=64 * 1024 * 1024):
    """x: (B, S, D) float32; params must come from prepare_params() (scale pre-folded).

    batch_block:      batch elements per grid step (default: _default_batch_block).
    compute_dtype:    dtype fed to the MXU (bfloat16 on v6e/v7x); accumulation and all
                      LayerNorm / softmax / residual math stays f32.
    attn_impl:        None -> "masked" for D <= 128, "split" (true head-split) otherwise.
    vmem_limit_bytes: 64 MiB default is fine on 128 MiB v5e/v6e; keep <= ~48 MiB on v7x.
    """
    B, S, D = x.shape
    H = NHEAD
    assert D % H == 0, "d_model must be divisible by nhead=8"
    bb = _default_batch_block(B, S) if batch_block is None else batch_block
    assert B % bb == 0, "batch_block must divide the batch size"
    grid = (B // bb,)
    if attn_impl is None:
        attn_impl = "masked" if D <= 128 else "split"

    def wcast(a):  # weight matrices / head mask -> MXU dtype
        return a if a.dtype == compute_dtype else a.astype(compute_dtype)

    head_mask = wcast(params["head_mask"])
    weights = [wcast(params["win_t"]), params["bin"],
               wcast(params["wo_t"]), params["bo"],
               params["ln1w"], params["ln1b"],
               wcast(params["w1_t"]), params["b1"],
               wcast(params["w2_t"]), params["b2"],
               params["ln2w"], params["ln2b"]]

    def full_spec(arr):
        nd = arr.ndim
        idx = lambda i, _nd=nd: (0,) * _nd
        try:
            # Constant-index-map residents need no double buffer: Buffered(1) halves
            # their VMEM footprint (key on v7x's 64 MiB VMEM).
            return pl.BlockSpec(arr.shape, idx, pipeline_mode=pl.Buffered(1))
        except TypeError:   # older jax without pipeline_mode support
            return pl.BlockSpec(arr.shape, idx)

    kernel = make_coreblock_kernel(S, D, H, compute_dtype, attn_impl)

    return pl.pallas_call(
        kernel,
        out_shape=jax.ShapeDtypeStruct((B, S, D), jnp.float32),
        grid_spec=pltpu.PrefetchScalarGridSpec(
            num_scalar_prefetch=0,
            grid=grid,
            in_specs=[pl.BlockSpec((bb, S, D), lambda i: (i, 0, 0)),
                      full_spec(head_mask)] + [full_spec(w) for w in weights],
            out_specs=pl.BlockSpec((bb, S, D), lambda i: (i, 0, 0)),
        ),
        compiler_params=pltpu.CompilerParams(
            dimension_semantics=("parallel",),
            vmem_limit_bytes=vmem_limit_bytes,
        ),
    )(x.astype(jnp.float32), head_mask, *weights)


def make_head_mask(dmodel, nhead):
    hd = dmodel // nhead
    h = jnp.arange(nhead, dtype=jnp.int32)[:, None]
    d = jnp.arange(dmodel, dtype=jnp.int32)[None, :]
    return (d // hd == h).astype(jnp.float32).reshape(1, nhead, 1, dmodel)


def prepare_params(params, nhead=NHEAD):
    """One-time weight transform: fold 1/sqrt(head_dim) into the q columns of the fused
    input projection (removes a per-grid-step (M, D) VPU multiply from the kernel)."""
    D = params["wo_t"].shape[0]
    scale = 1.0 / math.sqrt(D // nhead)
    col_scale = jnp.concatenate([jnp.full((D,), scale, jnp.float32),
                                 jnp.ones((2 * D,), jnp.float32)])[None, :]
    out = dict(params)
    out["win_t"] = params["win_t"] * col_scale
    out["bin"] = params["bin"] * col_scale
    return out


def make_params(key, dmodel, dimff):
    """Deterministic synthetic parameters (shapes match nn.TransformerEncoderLayer)."""
    ks = jax.random.split(key, 8)
    s_in = 1.0 / math.sqrt(dmodel)
    s_ff = 1.0 / math.sqrt(dimff)
    w_in = jax.random.uniform(ks[0], (3 * dmodel, dmodel), jnp.float32, -s_in, s_in)
    b_in = jax.random.uniform(ks[1], (3 * dmodel,), jnp.float32, -s_in, s_in)
    w_out = jax.random.uniform(ks[2], (dmodel, dmodel), jnp.float32, -s_in, s_in)
    b_out = jax.random.uniform(ks[3], (dmodel,), jnp.float32, -s_in, s_in)
    w1 = jax.random.uniform(ks[4], (dimff, dmodel), jnp.float32, -s_in, s_in)
    b1 = jax.random.uniform(ks[5], (dimff,), jnp.float32, -s_in, s_in)
    w2 = jax.random.uniform(ks[6], (dmodel, dimff), jnp.float32, -s_ff, s_ff)
    b2 = jax.random.uniform(ks[7], (dmodel,), jnp.float32, -s_ff, s_ff)
    return {
        "win_t": w_in.T,                 # (D, 3D)
        "bin": b_in[None, :],            # (1, 3D)
        "wo_t": w_out.T,                 # (D, D)
        "bo": b_out[None, :],            # (1, D)
        "ln1w": jnp.ones((1, dmodel), jnp.float32),
        "ln1b": jnp.zeros((1, dmodel), jnp.float32),
        "w1_t": w1.T,                    # (D, F)
        "b1": b1[None, :],               # (1, F)
        "w2_t": w2.T,                    # (F, D)
        "b2": b2[None, :],               # (1, D)
        "ln2w": jnp.ones((1, dmodel), jnp.float32),
        "ln2b": jnp.zeros((1, dmodel), jnp.float32),
        "head_mask": make_head_mask(dmodel, NHEAD),   # (1, H, 1, D)
    }


def reference_forward(x, p):
    """Pure-JAX reference of nn.TransformerEncoderLayer forward (eval mode, raw params)."""
    B, S, D = x.shape
    H, Hd = NHEAD, D // NHEAD
    qkv = x @ p["win_t"] + p["bin"]
    q, k, v = qkv[..., :D], qkv[..., D:2 * D], qkv[..., 2 * D:]

    def split_heads(t):
        return t.reshape(B, S, H, Hd).transpose(0, 2, 1, 3)

    qh, kh, vh = split_heads(q), split_heads(k), split_heads(v)
    s = jnp.einsum("bhqd,bhkd->bhqk", qh, kh) / math.sqrt(Hd)
    pattn = jax.nn.softmax(s, axis=-1)
    a = jnp.einsum("bhqk,bhkd->bhqd", pattn, vh).transpose(0, 2, 1, 3).reshape(B, S, D)
    a = a @ p["wo_t"] + p["bo"]

    def ln(t, w, b):
        mu = t.mean(-1, keepdims=True)
        var = ((t - mu) ** 2).mean(-1, keepdims=True)
        return (t - mu) * jax.lax.rsqrt(var + LN_EPS) * w + b

    y = ln(x + a, p["ln1w"], p["ln1b"])
    f = jnp.maximum(y @ p["w1_t"] + p["b1"], 0.0) @ p["w2_t"] + p["b2"]
    return ln(y + f, p["ln2w"], p["ln2b"])


if __name__ == "__main__":
    B, S, D, FF = 2, 8, 32, 64        # dmodel=32, dim_feedforward=64, nhead=8
    key = jax.random.PRNGKey(0)
    kx, kp = jax.random.split(key)
    x = jax.random.normal(kx, (B, S, D), jnp.float32)
    params = make_params(kp, D, FF)
    ref = reference_forward(x, params)
    kparams = prepare_params(params)           # one-time scale fold into win_t/bin

    # Config 1: f32 MXU path; default batch_block -> 2-step "parallel" grid.
    # Tolerance 2e-3 only absorbs the approx-reciprocal EUP softmax; math is otherwise f32.
    out_f32 = jax.block_until_ready(coreblock_forward(x, kparams))
    assert out_f32.shape == (B, S, D)
    assert jnp.allclose(out_f32, ref, atol=2e-3, rtol=2e-3), "f32 kernel mismatch vs reference"

    # Config 2: bf16-MXU path (v6e/v7x style): bf16 weights + bf16 attention matmuls,
    # f32 accumulation, f32 residual/LN (x kept f32 into the kernel).
    out_bf16 = jax.block_until_ready(
        coreblock_forward(x, kparams, compute_dtype=jnp.bfloat16))
    assert out_bf16.shape == (B, S, D)
    assert jnp.allclose(out_bf16, ref, atol=5e-2, rtol=5e-2), "bf16 kernel mismatch vs reference"

    print("KERNEL_OK")
</pallas_src>

<mosaic_0001>
module attributes {stable_mosaic.version = 11 : i64} {
  func.func @kernel(%arg0: i32, %arg1: memref<1x8x32xf32, #tpu.memory_space<vmem>>, %arg2: memref<1x8x1x32xf32, #tpu.memory_space<vmem>>, %arg3: memref<32x96xf32, #tpu.memory_space<vmem>>, %arg4: memref<1x96xf32, #tpu.memory_space<vmem>>, %arg5: memref<32x32xf32, #tpu.memory_space<vmem>>, %arg6: memref<1x32xf32, #tpu.memory_space<vmem>>, %arg7: memref<1x32xf32, #tpu.memory_space<vmem>>, %arg8: memref<1x32xf32, #tpu.memory_space<vmem>>, %arg9: memref<32x64xf32, #tpu.memory_space<vmem>>, %arg10: memref<1x64xf32, #tpu.memory_space<vmem>>, %arg11: memref<64x32xf32, #tpu.memory_space<vmem>>, %arg12: memref<1x32xf32, #tpu.memory_space<vmem>>, %arg13: memref<1x32xf32, #tpu.memory_space<vmem>>, %arg14: memref<1x32xf32, #tpu.memory_space<vmem>>, %arg15: memref<1x8x32xf32, #tpu.memory_space<vmem>>) attributes {dimension_semantics = [#tpu.dimension_semantics<parallel>], iteration_bounds = array<i64: 2>, scalar_prefetch = 0 : i64, scratch_operands = 0 : i64, tpu.core_type = #tpu.core_type<tc>, window_params = [{transform_indices = @transform_0, window_bounds = array<i64: 1, 8, 32>}, {pipeline_mode = #tpu.pipeline_mode<synchronous>, transform_indices = @transform_1, window_bounds = array<i64: 1, 8, 1, 32>}, {pipeline_mode = #tpu.pipeline_mode<synchronous>, transform_indices = @transform_2, window_bounds = array<i64: 32, 96>}, {pipeline_mode = #tpu.pipeline_mode<synchronous>, transform_indices = @transform_3, window_bounds = array<i64: 1, 96>}, {pipeline_mode = #tpu.pipeline_mode<synchronous>, transform_indices = @transform_4, window_bounds = array<i64: 32, 32>}, {pipeline_mode = #tpu.pipeline_mode<synchronous>, transform_indices = @transform_5, window_bounds = array<i64: 1, 32>}, {pipeline_mode = #tpu.pipeline_mode<synchronous>, transform_indices = @transform_6, window_bounds = array<i64: 1, 32>}, {pipeline_mode = #tpu.pipeline_mode<synchronous>, transform_indices = @transform_7, window_bounds = array<i64: 1, 32>}, {pipeline_mode = #tpu.pipeline_mode<synchronous>, transform_indices = @transform_8, window_bounds = array<i64: 32, 64>}, {pipeline_mode = #tpu.pipeline_mode<synchronous>, transform_indices = @transform_9, window_bounds = array<i64: 1, 64>}, {pipeline_mode = #tpu.pipeline_mode<synchronous>, transform_indices = @transform_10, window_bounds = array<i64: 64, 32>}, {pipeline_mode = #tpu.pipeline_mode<synchronous>, transform_indices = @transform_11, window_bounds = array<i64: 1, 32>}, {pipeline_mode = #tpu.pipeline_mode<synchronous>, transform_indices = @transform_12, window_bounds = array<i64: 1, 32>}, {pipeline_mode = #tpu.pipeline_mode<synchronous>, transform_indices = @transform_13, window_bounds = array<i64: 1, 32>}, {transform_indices = @transform_14, window_bounds = array<i64: 1, 8, 32>}]} {
    %c0 = arith.constant 0 : index
    %c0_0 = arith.constant 0 : index
    %c0_1 = arith.constant 0 : index
    %0 = vector.load %arg1[%c0, %c0_0, %c0_1] : memref<1x8x32xf32, #tpu.memory_space<vmem>>, vector<1x8x32xf32>
    %1 = vector.shape_cast %0 : vector<1x8x32xf32> to vector<8x32xf32>
    %c0_2 = arith.constant 0 : index
    %c0_3 = arith.constant 0 : index
    %2 = vector.load %arg3[%c0_2, %c0_3] : memref<32x96xf32, #tpu.memory_space<vmem>>, vector<32x96xf32>
    %cst = arith.constant dense<0.000000e+00> : vector<8x96xf32>
    %3 = tpu.matmul %1, %2, %cst {dimension_numbers = #tpu.dot_dimension_numbers<[1], [0], [0], [1], [0, 0, 1, 1], [], []>} : vector<8x32xf32>, vector<32x96xf32>, vector<8x96xf32> -> vector<8x96xf32>
    %c0_4 = arith.constant 0 : index
    %c0_5 = arith.constant 0 : index
    %4 = vector.load %arg4[%c0_4, %c0_5] : memref<1x96xf32, #tpu.memory_space<vmem>>, vector<1x96xf32>
    %5 = vector.broadcast %4 : vector<1x96xf32> to vector<8x96xf32>
    %6 = arith.addf %3, %5 : vector<8x96xf32>
    %7 = vector.extract_strided_slice %6 {offsets = [0, 0], sizes = [8, 32], strides = [1, 1]} : vector<8x96xf32> to vector<8x32xf32>
    %8 = vector.extract_strided_slice %6 {offsets = [0, 32], sizes = [8, 32], strides = [1, 1]} : vector<8x96xf32> to vector<8x32xf32>
    %9 = vector.extract_strided_slice %6 {offsets = [0, 64], sizes = [8, 32], strides = [1, 1]} : vector<8x96xf32> to vector<8x32xf32>
    %c0_6 = arith.constant 0 : index
    %c0_7 = arith.constant 0 : index
    %c0_8 = arith.constant 0 : index
    %c0_9 = arith.constant 0 : index
    %10 = vector.load %arg2[%c0_6, %c0_7, %c0_8, %c0_9] : memref<1x8x1x32xf32, #tpu.memory_space<vmem>>, vector<1x8x1x32xf32>
    %11 = vector.shape_cast %7 : vector<8x32xf32> to vector<1x1x8x32xf32>
    %12 = vector.broadcast %11 : vector<1x1x8x32xf32> to vector<1x8x8x32xf32>
    %13 = vector.broadcast %10 : vector<1x8x1x32xf32> to vector<1x8x8x32xf32>
    %14 = arith.mulf %12, %13 : vector<1x8x8x32xf32>
    %15 = vector.shape_cast %9 : vector<8x32xf32> to vector<1x1x8x32xf32>
    %16 = vector.broadcast %15 : vector<1x1x8x32xf32> to vector<1x8x8x32xf32>
    %17 = vector.broadcast %10 : vector<1x8x1x32xf32> to vector<1x8x8x32xf32>
    %18 = arith.mulf %16, %17 : vector<1x8x8x32xf32>
    %19 = vector.shape_cast %8 : vector<8x32xf32> to vector<1x8x32xf32>
    %20 = vector.shape_cast %14 : vector<1x8x8x32xf32> to vector<1x64x32xf32>
    "tpu.trace_start"() <{level = 10 : i32, message = "bmd,bkd->bmk"}> : () -> ()
    %cst_10 = arith.constant dense<0.000000e+00> : vector<1x64x8xf32>
    %21 = tpu.matmul %20, %19, %cst_10 {dimension_numbers = #tpu.dot_dimension_numbers<[2], [2], [1], [1], [0, 0, 0, 1, 1, 1], [0], [0]>} : vector<1x64x32xf32>, vector<1x8x32xf32>, vector<1x64x8xf32> -> vector<1x64x8xf32>
    "tpu.trace_stop"() : () -> ()
    %cst_11 = arith.constant dense<0xFF800000> : vector<1x64xf32>
    %22 = vector.multi_reduction <maximumf>, %21, %cst_11 [2] : vector<1x64x8xf32> to vector<1x64xf32>
    %23 = vector.shape_cast %22 : vector<1x64xf32> to vector<1x64x1xf32>
    %24 = vector.broadcast %23 : vector<1x64x1xf32> to vector<1x64x8xf32>
    %25 = arith.subf %21, %24 : vector<1x64x8xf32>
    %26 = math.exp %25 : vector<1x64x8xf32>
    %cst_12 = arith.constant dense<0.000000e+00> : vector<1x64xf32>
    %27 = vector.multi_reduction <add>, %26, %cst_12 [2] : vector<1x64x8xf32> to vector<1x64xf32>
    %28 = vector.shape_cast %27 : vector<1x64xf32> to vector<1x64x1xf32>
    %29 = tpu.reciprocal %28 {approx = true} : vector<1x64x1xf32> -> vector<1x64x1xf32>
    %30 = vector.broadcast %29 : vector<1x64x1xf32> to vector<1x64x8xf32>
    %31 = arith.mulf %26, %30 : vector<1x64x8xf32>
    %32 = vector.shape_cast %31 : vector<1x64x8xf32> to vector<8x8x8xf32>
    %33 = vector.shape_cast %18 : vector<1x8x8x32xf32> to vector<8x8x32xf32>
    "tpu.trace_start"() <{level = 10 : i32, message = "nqk,nkd->nqd"}> : () -> ()
    %cst_13 = arith.constant dense<0.000000e+00> : vector<8x8x32xf32>
    %34 = tpu.matmul %32, %33, %cst_13 {dimension_numbers = #tpu.dot_dimension_numbers<[2], [1], [1], [2], [0, 0, 0, 1, 1, 2], [0], [0]>} : vector<8x8x8xf32>, vector<8x8x32xf32>, vector<8x8x32xf32> -> vector<8x8x32xf32>
    "tpu.trace_stop"() : () -> ()
    %35 = vector.shape_cast %34 : vector<8x8x32xf32> to vector<1x8x8x32xf32>
    %cst_14 = arith.constant dense<0.000000e+00> : vector<1x8x32xf32>
    %36 = vector.multi_reduction <add>, %35, %cst_14 [1] : vector<1x8x8x32xf32> to vector<1x8x32xf32>
    %37 = vector.shape_cast %36 : vector<1x8x32xf32> to vector<8x32xf32>
    %c0_15 = arith.constant 0 : index
    %c0_16 = arith.constant 0 : index
    %38 = vector.load %arg5[%c0_15, %c0_16] : memref<32x32xf32, #tpu.memory_space<vmem>>, vector<32x32xf32>
    %cst_17 = arith.constant dense<0.000000e+00> : vector<8x32xf32>
    %39 = tpu.matmul %37, %38, %cst_17 {dimension_numbers = #tpu.dot_dimension_numbers<[1], [0], [0], [1], [0, 0, 1, 1], [], []>} : vector<8x32xf32>, vector<32x32xf32>, vector<8x32xf32> -> vector<8x32xf32>
    %c0_18 = arith.constant 0 : index
    %c0_19 = arith.constant 0 : index
    %40 = vector.load %arg6[%c0_18, %c0_19] : memref<1x32xf32, #tpu.memory_space<vmem>>, vector<1x32xf32>
    %41 = vector.broadcast %40 : vector<1x32xf32> to vector<8x32xf32>
    %42 = arith.addf %39, %41 : vector<8x32xf32>
    %43 = arith.addf %1, %42 : vector<8x32xf32>
    %c0_20 = arith.constant 0 : index
    %c0_21 = arith.constant 0 : index
    %44 = vector.load %arg7[%c0_20, %c0_21] : memref<1x32xf32, #tpu.memory_space<vmem>>, vector<1x32xf32>
    %c0_22 = arith.constant 0 : index
    %c0_23 = arith.constant 0 : index
    %45 = vector.load %arg8[%c0_22, %c0_23] : memref<1x32xf32, #tpu.memory_space<vmem>>, vector<1x32xf32>
    %cst_24 = arith.constant dense<0.000000e+00> : vector<8xf32>
    %46 = vector.multi_reduction <add>, %43, %cst_24 [1] : vector<8x32xf32> to vector<8xf32>
    %47 = vector.shape_cast %46 : vector<8xf32> to vector<8x1xf32>
    %cst_25 = arith.constant 3.200000e+01 : f32
    %48 = vector.broadcast %cst_25 : f32 to vector<8x1xf32>
    %49 = arith.divf %47, %48 : vector<8x1xf32>
    %50 = vector.broadcast %49 : vector<8x1xf32> to vector<8x32xf32>
    %51 = arith.subf %43, %50 : vector<8x32xf32>
    %52 = arith.mulf %51, %51 : vector<8x32xf32>
    %cst_26 = arith.constant dense<0.000000e+00> : vector<8xf32>
    %53 = vector.multi_reduction <add>, %52, %cst_26 [1] : vector<8x32xf32> to vector<8xf32>
    %54 = vector.shape_cast %53 : vector<8xf32> to vector<8x1xf32>
    %cst_27 = arith.constant 3.200000e+01 : f32
    %55 = vector.broadcast %cst_27 : f32 to vector<8x1xf32>
    %56 = arith.divf %54, %55 : vector<8x1xf32>
    %57 = vector.broadcast %49 : vector<8x1xf32> to vector<8x32xf32>
    %58 = arith.subf %43, %57 : vector<8x32xf32>
    %cst_28 = arith.constant 9.99999974E-6 : f32
    %59 = vector.broadcast %cst_28 : f32 to vector<8x1xf32>
    %60 = arith.addf %56, %59 : vector<8x1xf32>
    %61 = math.rsqrt %60 : vector<8x1xf32>
    %62 = vector.broadcast %61 : vector<8x1xf32> to vector<8x32xf32>
    %63 = arith.mulf %58, %62 : vector<8x32xf32>
    %64 = vector.broadcast %44 : vector<1x32xf32> to vector<8x32xf32>
    %65 = arith.mulf %63, %64 : vector<8x32xf32>
    %66 = vector.broadcast %45 : vector<1x32xf32> to vector<8x32xf32>
    %67 = arith.addf %65, %66 : vector<8x32xf32>
    %c0_29 = arith.constant 0 : index
    %c0_30 = arith.constant 0 : index
    %68 = vector.load %arg9[%c0_29, %c0_30] : memref<32x64xf32, #tpu.memory_space<vmem>>, vector<32x64xf32>
    %cst_31 = arith.constant dense<0.000000e+00> : vector<8x64xf32>
    %69 = tpu.matmul %67, %68, %cst_31 {dimension_numbers = #tpu.dot_dimension_numbers<[1], [0], [0], [1], [0, 0, 1, 1], [], []>} : vector<8x32xf32>, vector<32x64xf32>, vector<8x64xf32> -> vector<8x64xf32>
    %c0_32 = arith.constant 0 : index
    %c0_33 = arith.constant 0 : index
    %70 = vector.load %arg10[%c0_32, %c0_33] : memref<1x64xf32, #tpu.memory_space<vmem>>, vector<1x64xf32>
    %71 = vector.broadcast %70 : vector<1x64xf32> to vector<8x64xf32>
    %72 = arith.addf %69, %71 : vector<8x64xf32>
    %cst_34 = arith.constant 0.000000e+00 : f32
    %73 = vector.broadcast %cst_34 : f32 to vector<8x64xf32>
    %74 = arith.maximumf %72, %73 : vector<8x64xf32>
    %c0_35 = arith.constant 0 : index
    %c0_36 = arith.constant 0 : index
    %75 = vector.load %arg11[%c0_35, %c0_36] : memref<64x32xf32, #tpu.memory_space<vmem>>, vector<64x32xf32>
    %cst_37 = arith.constant dense<0.000000e+00> : vector<8x32xf32>
    %76 = tpu.matmul %74, %75, %cst_37 {dimension_numbers = #tpu.dot_dimension_numbers<[1], [0], [0], [1], [0, 0, 1, 1], [], []>} : vector<8x64xf32>, vector<64x32xf32>, vector<8x32xf32> -> vector<8x32xf32>
    %c0_38 = arith.constant 0 : index
    %c0_39 = arith.constant 0 : index
    %77 = vector.load %arg12[%c0_38, %c0_39] : memref<1x32xf32, #tpu.memory_space<vmem>>, vector<1x32xf32>
    %78 = vector.broadcast %77 : vector<1x32xf32> to vector<8x32xf32>
    %79 = arith.addf %76, %78 : vector<8x32xf32>
    %80 = arith.addf %67, %79 : vector<8x32xf32>
    %c0_40 = arith.constant 0 : index
    %c0_41 = arith.constant 0 : index
    %81 = vector.load %arg13[%c0_40, %c0_41] : memref<1x32xf32, #tpu.memory_space<vmem>>, vector<1x32xf32>
    %c0_42 = arith.constant 0 : index
    %c0_43 = arith.constant 0 : index
    %82 = vector.load %arg14[%c0_42, %c0_43] : memref<1x32xf32, #tpu.memory_space<vmem>>, vector<1x32xf32>
    %cst_44 = arith.constant dense<0.000000e+00> : vector<8xf32>
    %83 = vector.multi_reduction <add>, %80, %cst_44 [1] : vector<8x32xf32> to vector<8xf32>
    %84 = vector.shape_cast %83 : vector<8xf32> to vector<8x1xf32>
    %cst_45 = arith.constant 3.200000e+01 : f32
    %85 = vector.broadcast %cst_45 : f32 to vector<8x1xf32>
    %86 = arith.divf %84, %85 : vector<8x1xf32>
    %87 = vector.broadcast %86 : vector<8x1xf32> to vector<8x32xf32>
    %88 = arith.subf %80, %87 : vector<8x32xf32>
    %89 = arith.mulf %88, %88 : vector<8x32xf32>
    %cst_46 = arith.constant dense<0.000000e+00> : vector<8xf32>
    %90 = vector.multi_reduction <add>, %89, %cst_46 [1] : vector<8x32xf32> to vector<8xf32>
    %91 = vector.shape_cast %90 : vector<8xf32> to vector<8x1xf32>
    %cst_47 = arith.constant 3.200000e+01 : f32
    %92 = vector.broadcast %cst_47 : f32 to vector<8x1xf32>
    %93 = arith.divf %91, %92 : vector<8x1xf32>
    %94 = vector.broadcast %86 : vector<8x1xf32> to vector<8x32xf32>
    %95 = arith.subf %80, %94 : vector<8x32xf32>
    %cst_48 = arith.constant 9.99999974E-6 : f32
    %96 = vector.broadcast %cst_48 : f32 to vector<8x1xf32>
    %97 = arith.addf %93, %96 : vector<8x1xf32>
    %98 = math.rsqrt %97 : vector<8x1xf32>
    %99 = vector.broadcast %98 : vector<8x1xf32> to vector<8x32xf32>
    %100 = arith.mulf %95, %99 : vector<8x32xf32>
    %101 = vector.broadcast %81 : vector<1x32xf32> to vector<8x32xf32>
    %102 = arith.mulf %100, %101 : vector<8x32xf32>
    %103 = vector.broadcast %82 : vector<1x32xf32> to vector<8x32xf32>
    %104 = arith.addf %102, %103 : vector<8x32xf32>
    %105 = vector.shape_cast %104 : vector<8x32xf32> to vector<1x8x32xf32>
    %c0_49 = arith.constant 0 : index
    %c0_50 = arith.constant 0 : index
    %c0_51 = arith.constant 0 : index
    %106 = vector.load %arg15[%c0_49, %c0_50, %c0_51] : memref<1x8x32xf32, #tpu.memory_space<vmem>>, vector<1x8x32xf32>
    tpu.vector_store %arg15[%c0_49, %c0_50, %c0_51], %105 {strides = array<i32>} : memref<1x8x32xf32, #tpu.memory_space<vmem>>, vector<1x8x32xf32>,
    return
  }
  func.func @transform_0(%arg0: i32) -> (i32, i32, i32) {
    %c0_i32 = arith.constant 0 : i32
    %c0_i32_0 = arith.constant 0 : i32
    %c0_i32_1 = arith.constant 0 : i32
    return %arg0, %c0_i32, %c0_i32_0 : i32, i32, i32
  }
  func.func @transform_1(%arg0: i32) -> (i32, i32, i32, i32) {
    %c0_i32 = arith.constant 0 : i32
    %c0_i32_0 = arith.constant 0 : i32
    %c0_i32_1 = arith.constant 0 : i32
    %c0_i32_2 = arith.constant 0 : i32
    %c0_i32_3 = arith.constant 0 : i32
    return %c0_i32, %c0_i32_0, %c0_i32_1, %c0_i32_2 : i32, i32, i32, i32
  }
  func.func @transform_2(%arg0: i32) -> (i32, i32) {
    %c0_i32 = arith.constant 0 : i32
    %c0_i32_0 = arith.constant 0 : i32
    %c0_i32_1 = arith.constant 0 : i32
    return %c0_i32, %c0_i32_0 : i32, i32
  }
  func.func @transform_3(%arg0: i32) -> (i32, i32) {
    %c0_i32 = arith.constant 0 : i32
    %c0_i32_0 = arith.constant 0 : i32
    %c0_i32_1 = arith.constant 0 : i32
    return %c0_i32, %c0_i32_0 : i32, i32
  }
  func.func @transform_4(%arg0: i32) -> (i32, i32) {
    %c0_i32 = arith.constant 0 : i32
    %c0_i32_0 = arith.constant 0 : i32
    %c0_i32_1 = arith.constant 0 : i32
    return %c0_i32, %c0_i32_0 : i32, i32
  }
  func.func @transform_5(%arg0: i32) -> (i32, i32) {
    %c0_i32 = arith.constant 0 : i32
    %c0_i32_0 = arith.constant 0 : i32
    %c0_i32_1 = arith.constant 0 : i32
    return %c0_i32, %c0_i32_0 : i32, i32
  }
  func.func @transform_6(%arg0: i32) -> (i32, i32) {
    %c0_i32 = arith.constant 0 : i32
    %c0_i32_0 = arith.constant 0 : i32
    %c0_i32_1 = arith.constant 0 : i32
    return %c0_i32, %c0_i32_0 : i32, i32
  }
  func.func @transform_7(%arg0: i32) -> (i32, i32) {
    %c0_i32 = arith.constant 0 : i32
    %c0_i32_0 = arith.constant 0 : i32
    %c0_i32_1 = arith.constant 0 : i32
    return %c0_i32, %c0_i32_0 : i32, i32
  }
  func.func @transform_8(%arg0: i32) -> (i32, i32) {
    %c0_i32 = arith.constant 0 : i32
    %c0_i32_0 = arith.constant 0 : i32
    %c0_i32_1 = arith.constant 0 : i32
    return %c0_i32, %c0_i32_0 : i32, i32
  }
  func.func @transform_9(%arg0: i32) -> (i32, i32) {
    %c0_i32 = arith.constant 0 : i32
    %c0_i32_0 = arith.constant 0 : i32
    %c0_i32_1 = arith.constant 0 : i32
    return %c0_i32, %c0_i32_0 : i32, i32
  }
  func.func @transform_10(%arg0: i32) -> (i32, i32) {
    %c0_i32 = arith.constant 0 : i32
    %c0_i32_0 = arith.constant 0 : i32
    %c0_i32_1 = arith.constant 0 : i32
    return %c0_i32, %c0_i32_0 : i32, i32
  }
  func.func @transform_11(%arg0: i32) -> (i32, i32) {
    %c0_i32 = arith.constant 0 : i32
    %c0_i32_0 = arith.constant 0 : i32
    %c0_i32_1 = arith.constant 0 : i32
    return %c0_i32, %c0_i32_0 : i32, i32
  }
  func.func @transform_12(%arg0: i32) -> (i32, i32) {
    %c0_i32 = arith.constant 0 : i32
    %c0_i32_0 = arith.constant 0 : i32
    %c0_i32_1 = arith.constant 0 : i32
    return %c0_i32, %c0_i32_0 : i32, i32
  }
  func.func @transform_13(%arg0: i32) -> (i32, i32) {
    %c0_i32 = arith.constant 0 : i32
    %c0_i32_0 = arith.constant 0 : i32
    %c0_i32_1 = arith.constant 0 : i32
    return %c0_i32, %c0_i32_0 : i32, i32
  }
  func.func @transform_14(%arg0: i32) -> (i32, i32, i32) {
    %c0_i32 = arith.constant 0 : i32
    %c0_i32_0 = arith.constant 0 : i32
    %c0_i32_1 = arith.constant 0 : i32
    return %arg0, %c0_i32, %c0_i32_0 : i32, i32, i32
  }
}

</mosaic_0001>

<bundles_post_ra>
// kernel: tpu_custom_call.1
= control target key start
LH: loop header
LB: loop body
LE: loop exit
PB: predicated region body
PF: predicated region fallthrough
CT: control target
= control target key end

     0   :  { %s3931_s0 = inlined_call_operand.hbm [shape: f32[2,8,32], index: 0, kind: input, shape index: {}]   ;;  %s3932_s1 = inlined_call_operand.hbm [shape: f32[1,8,1,32], index: 1, kind: input, shape index: {}]   ;;  %s3933_s2 = inlined_call_operand.hbm [shape: f32[32,96], index: 2, kind: input, shape index: {}]   ;;  %s3934_s3 = inlined_call_operand.hbm [shape: f32[1,96], index: 3, kind: input, shape index: {}]   ;;  %s3935_s4 = inlined_call_operand.hbm [shape: f32[32,32], index: 4, kind: input, shape index: {}]   ;;  %s3936_s5 = inlined_call_operand.hbm [shape: f32[1,32], index: 5, kind: input, shape index: {}]   ;;  %s3937_s6 = inlined_call_operand.hbm [shape: f32[1,32], index: 6, kind: input, shape index: {}]   ;;  %s3938_s7 = inlined_call_operand.hbm [shape: f32[1,32], index: 7, kind: input, shape index: {}]   ;;  %s3939_s8 = inlined_call_operand.hbm [shape: f32[32,64], index: 8, kind: input, shape index: {}]   ;;  %s3940_s9 = inlined_call_operand.hbm [shape: f32[1,64], index: 9, kind: input, shape index: {}]   ;;  %s3941_s10 = inlined_call_operand.hbm [shape: f32[64,32], index: 10, kind: input, shape index: {}]   ;;  %s3942_s11 = inlined_call_operand.hbm [shape: f32[1,32], index: 11, kind: input, shape index: {}]   ;;  %s3943_s12 = inlined_call_operand.hbm [shape: f32[1,32], index: 12, kind: input, shape index: {}]   ;;  %s3944_s13 = inlined_call_operand.hbm [shape: f32[1,32], index: 13, kind: input, shape index: {}]   ;;  %s3945_s14 = inlined_call_operand.hbm [shape: f32[2,8,32], index: 14, kind: output, shape index: {}]  }
   0x1   :  { %3956 = sst [smem:[#allocation39_spill]] %s3931_s0 }
   0x2   :  { %3957 = sst [smem:[#allocation40_spill]] %s3932_s1 }
   0x3   :  { %3958 = sst [smem:[#allocation41_spill]] %s3934_s3 }
   0x4   :  { %3959 = sst [smem:[#allocation42_spill]] %s3945_s14 }
   0x5   :  { %19 = vsyncpa [#allocation3], 0 }
   0x6   :  { %21 = vsyncpa [#allocation3 + $0x1], 0 }
   0x7   :  { %22 = vsyncpa [#allocation6], 0 }
   0x8   :  { %23 = vsyncpa [#allocation9], 0 }
   0x9   :  { %24 = vsyncpa [#allocation12], 0 }
   0xa   :  { %25 = vsyncpa [#allocation15], 0 }
   0xb   :  { %26 = vsyncpa [#allocation18], 0 }
   0xc   :  { %27 = vsyncpa [#allocation21], 0 }
   0xd   :  { %28 = vsyncpa [#allocation24], 0 }
   0xe   :  { %29 = vsyncpa [#allocation4], 0 }
   0xf   :  { %31 = vsyncpa [#allocation4 + $0x1], 0  ;;  %s3291_s29 = smov 0   ;;  %s3293_s30 = smov 0  }
  0x10   :  { %s3295_s15 = smov 0   ;;  %s3297_s16 = smov 0  }
  0x11 LB: > { %3960 = sst [smem:[#allocation35_spill]] %s3178_s29  ;;  %s3192_s17 = smov [#allocation5]   ;;  %s3190_s16 = sphi %s3297_s16, %s4004_s16   ;;  %s3186_s15 = sphi %s3295_s15, %s4003_s15   ;;  %s3182_s30 = sphi %s3293_s30, %s4002_s30   ;;  %s3178_s29 = sphi %s3291_s29, %s4001_s29  }
  0x12   : > { %3961 = sst [smem:[#allocation36_spill]] %s3182_s30  ;;  %s379_s18 = sshll.u32 %s3192_s17, 4  ;;  %s3317_s18 = int_to_ptr.vmem [resolvable:$true] %s379_s18 }
  0x13   : > { %s3312_s19 = sadd.s32 4294967295, %s3190_s16   ;;  %p2221_p0 = scmp.ge.s32.totalorder %s3190_s16, 1 }
  0x14   : > { %3962 = sst [smem:[#allocation37_spill]] %s3312_s19  ;;  %p3953_p1 = scmp.eq.s32.totalorder %s3312_s19, 0 }
  0x15   : > { %p367_p2 = scmp.lt.s32.totalorder %s3190_s16, 3  ;;  %s3193_s21 = smov [#allocation8]  }
  0x16   : > { %s406_s22 = sshll.u32 %s3193_s21, 4  ;;  %s3194_s24 = smov [#allocation11]   ;;  %s3332_s22 = int_to_ptr.vmem [resolvable:$true] %s406_s22 }
  0x17   : > { %p3319_p3 = pnand %p2221_p0, %p367_p2  ;;  %s430_s25 = sshll.u32 %s3194_s24, 4  ;;  %s3334_s25 = int_to_ptr.vmem [resolvable:$true] %s430_s25 }
  0x18   : > { %s3966_s1 = sld [smem:[#allocation40_spill]] }
  0x19   : > { %s3963_s20 = scalar_select %p3319_p3, 1, 0 }
  0x1a   : > { %p2536_p5 = pneg %p3319_p3 }
  0x1b   : > { %3964 = sst [smem:[#allocation38_spill]] %s3963_s20 }
  0x1c   : > { %p3328_p6 = pnand %p2536_p5, %p3953_p1 }
  0x1e   : > { %s2702_s28 = scalar_lea.hbm %s3966_s1, 128  ;;  %p3344_p8 = pneg %p3328_p6 }
  0x1f   : > { %p2703_p7 = scmp.ne.s32.totalorder %s3966_s1, %s2702_s28  ;;  %p2709_p11 = scmp.lt.u32.totalorder %s2702_s28, %s3966_s1 }
  0x21   : > { %p2705_p9 = pnand %p3344_p8, %p2703_p7 }
  0x23   : > { %p2706_p10 = pneg %p2705_p9 }
  0x25   : > { %p2711_p12 = pnand %p2709_p11, %p2706_p10 }
  0x27   : > { %2714 = shalt.err (!%p2711_p12)
}
  0x28   : > { %s2715_s14 = scalar_lea.vmem %s3317_s18, 128  ;;  %p2723_p5 = scmp.lt.s32.totalorder %s3317_s18, %s3317_s18 }
  0x29   : > { %p2716_p13 = scmp.ne.s32.totalorder %s3317_s18, %s2715_s14  ;;  %p2724_p4 = scmp.lt.s32.totalorder %s2715_s14, %s2715_s14 }
  0x2b   : > { %p2718_p0 = pnand %p2716_p13, %p3344_p8  ;;  %p2725_p7 = por %p2724_p4, %p2723_p5 }
  0x2d   : > { %p2719_p2 = pneg %p2718_p0 }
  0x2f   : > { %p2726_p9 = pnand %p2725_p7, %p2719_p2 }
  0x31   : > { %2729 = shalt.err (!%p2726_p9)
}
  0x32   : > { %s3195_s26 = smov 16   ;;  %s3196_s20 = smov 1  }
  0x33   : > { %2539 = dma.hbm_to_vmem [thread:$0]  (!%p3328_p6), %s3966_s1, 128, %s3317_s18, [#allocation6], %s3195_s26, %s3195_s26, %s3196_s20  }
  0x34   : > { %s3968_s3 = sld [smem:[#allocation41_spill]] }
  0x3a   : > { %s2730_s0 = scalar_lea.hbm %s3968_s3, 16 }
  0x3b   : > { %p2731_p4 = scmp.ne.s32.totalorder %s3968_s3, %s2730_s0  ;;  %p2737_p12 = scmp.lt.u32.totalorder %s2730_s0, %s3968_s3 }
  0x3d   : > { %p2733_p10 = pnand %p2731_p4, %p3344_p8 }
  0x3f   : > { %p2734_p11 = pneg %p2733_p10 }
  0x41   : > { %p2739_p13 = pnand %p2737_p12, %p2734_p11 }
  0x43   : > { %2742 = shalt.err (!%p2739_p13)
}
  0x44   : > { %s2743_s18 = scalar_lea.vmem %s3332_s22, 16  ;;  %s2750_s29 = scalar_lea.vmem %s3332_s22, 32 }
  0x45   : > { %p2744_p0 = scmp.ne.s32.totalorder %s3332_s22, %s2743_s18  ;;  %p2751_p7 = scmp.lt.s32.totalorder %s3332_s22, %s3332_s22 }
  0x46   : > { %p2752_p9 = scmp.lt.s32.totalorder %s2750_s29, %s2743_s18 }
  0x47   : > { %p2746_p2 = pnand %p2744_p0, %p3344_p8 }
  0x48   : > { %p2753_p4 = por %p2752_p9, %p2751_p7 }
  0x49   : > { %p2747_p5 = pneg %p2746_p2 }
  0x4b   : > { %p2754_p10 = pnand %p2753_p4, %p2747_p5 }
  0x4d   : > { %2757 = shalt.err (!%p2754_p10)
}
  0x4e   : > { %2545 = dma.hbm_to_vmem [thread:$0]  (!%p3328_p6), %s3968_s3, 16, %s3332_s22, [#allocation9]  }
  0x4f   : > { %s2758_s20 = scalar_lea.hbm %s3936_s5, 16 }
  0x50   : > { %p2759_p11 = scmp.ne.s32.totalorder %s3936_s5, %s2758_s20  ;;  %p2765_p0 = scmp.lt.u32.totalorder %s2758_s20, %s3936_s5 }
  0x52   : > { %p2761_p12 = pnand %p2759_p11, %p3344_p8 }
  0x54   : > { %p2762_p13 = pneg %p2761_p12 }
  0x56   : > { %p2767_p2 = pnand %p2765_p0, %p2762_p13 }
  0x58   : > { %2770 = shalt.err (!%p2767_p2)
}
  0x59   : > { %s2771_s22 = scalar_lea.vmem %s3334_s25, 16  ;;  %s2778_s14 = scalar_lea.vmem %s3334_s25, 32 }
  0x5a   : > { %p2772_p5 = scmp.ne.s32.totalorder %s3334_s25, %s2771_s22  ;;  %p2779_p4 = scmp.lt.s32.totalorder %s3334_s25, %s3334_s25 }
  0x5b   : > { %p2780_p10 = scmp.lt.s32.totalorder %s2778_s14, %s2771_s22 }
  0x5c   : > { %p2774_p7 = pnand %p2772_p5, %p3344_p8 }
  0x5d   : > { %p2781_p11 = por %p2780_p10, %p2779_p4 }
  0x5e   : > { %p2775_p9 = pneg %p2774_p7 }
  0x60   : > { %p2782_p12 = pnand %p2781_p11, %p2775_p9 }
  0x62   : > { %2785 = shalt.err (!%p2782_p12)
}
  0x63   : > { %2551 = dma.hbm_to_vmem [thread:$0]  (!%p3328_p6), %s3936_s5, 16, %s3334_s25, [#allocation12]  }
  0x64   : > { %s3197_s0 = smov [#allocation14]   ;;  %s3198_s19 = smov [#allocation17]  }
  0x65   : > { %s452_s30 = sshll.u32 %s3197_s0, 4  ;;  %s476_s26 = sshll.u32 %s3198_s19, 4  ;;  %s453_s30 = int_to_ptr.vmem [resolvable:$true] %s452_s30  ;;  %s477_s26 = int_to_ptr.vmem [resolvable:$true] %s476_s26 }
  0x66   : > { %s2786_s28 = scalar_lea.hbm %s3938_s7, 16 }
  0x67   : > { %p2787_p13 = scmp.ne.s32.totalorder %s3938_s7, %s2786_s28  ;;  %p2793_p5 = scmp.lt.u32.totalorder %s2786_s28, %s3938_s7 }
  0x69   : > { %p2789_p0 = pnand %p2787_p13, %p3344_p8 }
  0x6b   : > { %p2790_p2 = pneg %p2789_p0 }
  0x6d   : > { %p2795_p7 = pnand %p2793_p5, %p2790_p2 }
  0x6f   : > { %2798 = shalt.err (!%p2795_p7)
}
  0x70   : > { %s2799_s25 = scalar_lea.vmem %s453_s30, 16  ;;  %s2806_s18 = scalar_lea.vmem %s453_s30, 32 }
  0x71   : > { %p2800_p9 = scmp.ne.s32.totalorder %s453_s30, %s2799_s25  ;;  %p2807_p11 = scmp.lt.s32.totalorder %s453_s30, %s453_s30 }
  0x72   : > { %p2808_p12 = scmp.lt.s32.totalorder %s2806_s18, %s2799_s25 }
  0x73   : > { %p2802_p4 = pnand %p2800_p9, %p3344_p8 }
  0x74   : > { %p2809_p1 = por %p2808_p12, %p2807_p11 }
  0x75   : > { %p2803_p10 = pneg %p2802_p4 }
  0x77   : > { %p2810_p3 = pnand %p2809_p1, %p2803_p10 }
  0x79   : > { %2813 = shalt.err (!%p2810_p3)
}
  0x7a   : > { %2557 = dma.hbm_to_vmem [thread:$0]  (!%p3328_p6), %s3938_s7, 16, %s453_s30, [#allocation15]  }
  0x7b   : > { %s2814_s27 = scalar_lea.hbm %s3940_s9, 16 }
  0x7c   : > { %p2815_p13 = scmp.ne.s32.totalorder %s3940_s9, %s2814_s27  ;;  %p2821_p3 = scmp.lt.u32.totalorder %s2814_s27, %s3940_s9 }
  0x7e   : > { %p2817_p0 = pnand %p2815_p13, %p3344_p8 }
  0x80   : > { %p2818_p1 = pneg %p2817_p0 }
  0x82   : > { %p2823_p2 = pnand %p2821_p3, %p2818_p1 }
  0x84   : > { %2826 = shalt.err (!%p2823_p2)
}
  0x85   : > { %s2827_s14 = scalar_lea.vmem %s477_s26, 16  ;;  %s2834_s30 = scalar_lea.vmem %s477_s26, 32 }
  0x86   : > { %p2828_p5 = scmp.ne.s32.totalorder %s477_s26, %s2827_s14  ;;  %p2835_p4 = scmp.lt.s32.totalorder %s477_s26, %s477_s26 }
  0x87   : > { %p2836_p10 = scmp.lt.s32.totalorder %s2834_s30, %s2827_s14 }
  0x88   : > { %p2830_p7 = pnand %p2828_p5, %p3344_p8 }
  0x89   : > { %p2837_p11 = por %p2836_p10, %p2835_p4 }
  0x8a   : > { %p2831_p9 = pneg %p2830_p7 }
  0x8c   : > { %p2838_p12 = pnand %p2837_p11, %p2831_p9 }
  0x8e   : > { %2841 = shalt.err (!%p2838_p12)
}
  0x8f   : > { %2563 = dma.hbm_to_vmem [thread:$0]  (!%p3328_p6), %s3940_s9, 16, %s477_s26, [#allocation18]  }
  0x90   : > { %s3199_s29 = smov [#allocation20]   ;;  %s3200_s19 = smov [#allocation7]  }
  0x91   : > { %s500_s0 = sshll.u32 %s3199_s29, 4  ;;  %s392_s20 = sshll.u32 %s3200_s19, 4  ;;  %s501_s0 = int_to_ptr.vmem [resolvable:$true] %s500_s0  ;;  %s393_s20 = int_to_ptr.vmem [resolvable:$true] %s392_s20 }
  0x92   : > { %s2842_s17 = scalar_lea.hbm %s3942_s11, 16 }
  0x93   : > { %p2843_p13 = scmp.ne.s32.totalorder %s3942_s11, %s2842_s17  ;;  %p2849_p3 = scmp.lt.u32.totalorder %s2842_s17, %s3942_s11 }
  0x95   : > { %p2845_p0 = pnand %p2843_p13, %p3344_p8 }
  0x97   : > { %p2846_p1 = pneg %p2845_p0 }
  0x99   : > { %p2851_p2 = pnand %p2849_p3, %p2846_p1 }
  0x9b   : > { %2854 = shalt.err (!%p2851_p2)
}
  0x9c   : > { %s2855_s26 = scalar_lea.vmem %s501_s0, 16  ;;  %s2862_s25 = scalar_lea.vmem %s501_s0, 32 }
  0x9d   : > { %p2856_p5 = scmp.ne.s32.totalorder %s501_s0, %s2855_s26  ;;  %p2863_p4 = scmp.lt.s32.totalorder %s501_s0, %s501_s0 }
  0x9e   : > { %p2864_p10 = scmp.lt.s32.totalorder %s2862_s25, %s2855_s26 }
  0x9f   : > { %p2858_p7 = pnand %p2856_p5, %p3344_p8 }
  0xa0   : > { %p2865_p11 = por %p2864_p10, %p2863_p4 }
  0xa1   : > { %p2859_p9 = pneg %p2858_p7 }
  0xa3   : > { %p2866_p12 = pnand %p2865_p11, %p2859_p9 }
  0xa5   : > { %2869 = shalt.err (!%p2866_p12)
}
  0xa6   : > { %2569 = dma.hbm_to_vmem [thread:$0]  (!%p3328_p6), %s3942_s11, 16, %s501_s0, [#allocation21]  }
  0xa7   : > { %s2870_s28 = scalar_lea.hbm %s3933_s2, 512 }
  0xa8   : > { %p2871_p13 = scmp.ne.s32.totalorder %s3933_s2, %s2870_s28  ;;  %p2877_p3 = scmp.lt.u32.totalorder %s2870_s28, %s3933_s2 }
  0xaa   : > { %p2873_p0 = pnand %p2871_p13, %p3344_p8 }
  0xac   : > { %p2874_p1 = pneg %p2873_p0 }
  0xae   : > { %p2879_p2 = pnand %p2877_p3, %p2874_p1 }
  0xb0   : > { %2882 = shalt.err (!%p2879_p2)
}
  0xb1   : > { %s2883_s30 = scalar_lea.vmem %s393_s20, 512  ;;  %p2891_p4 = scmp.lt.s32.totalorder %s393_s20, %s393_s20 }
  0xb2   : > { %p2884_p5 = scmp.ne.s32.totalorder %s393_s20, %s2883_s30  ;;  %p2892_p10 = scmp.lt.s32.totalorder %s2883_s30, %s2883_s30 }
  0xb4   : > { %p2886_p7 = pnand %p2884_p5, %p3344_p8  ;;  %p2893_p11 = por %p2892_p10, %p2891_p4 }
  0xb6   : > { %p2887_p9 = pneg %p2886_p7 }
  0xb8   : > { %p2894_p12 = pnand %p2893_p11, %p2887_p9 }
  0xba   : > { %2897 = shalt.err (!%p2894_p12)
}
  0xbb   : > { %s3201_s0 = smov 128   ;;  %s3202_s26 = smov 8  }
  0xbc   : > { %2542 = dma.hbm_to_vmem [thread:$0]  (!%p3328_p6), %s3933_s2, 512, %s393_s20, [#allocation6], %s3201_s0, %s3201_s0, %s3202_s26  }
  0xbd   : > { %s3203_s29 = smov [#allocation10]   ;;  %s3204_s27 = smov [#allocation13]  }
  0xbe   : > { %s416_s19 = sshll.u32 %s3203_s29, 4  ;;  %s441_s28 = sshll.u32 %s3204_s27, 4  ;;  %s417_s19 = int_to_ptr.vmem [resolvable:$true] %s416_s19  ;;  %s442_s28 = int_to_ptr.vmem [resolvable:$true] %s441_s28 }
  0xbf   : > { %s2898_s22 = scalar_lea.hbm %s3935_s4, 512 }
  0xc0   : > { %p2899_p13 = scmp.ne.s32.totalorder %s3935_s4, %s2898_s22  ;;  %p2905_p3 = scmp.lt.u32.totalorder %s2898_s22, %s3935_s4 }
  0xc2   : > { %p2901_p0 = pnand %p2899_p13, %p3344_p8 }
  0xc4   : > { %p2902_p1 = pneg %p2901_p0 }
  0xc6   : > { %p2907_p2 = pnand %p2905_p3, %p2902_p1 }
  0xc8   : > { %2910 = shalt.err (!%p2907_p2)
}
  0xc9   : > { %s2911_s20 = scalar_lea.vmem %s417_s19, 512  ;;  %p2919_p4 = scmp.lt.s32.totalorder %s417_s19, %s417_s19 }
  0xca   : > { %p2912_p5 = scmp.ne.s32.totalorder %s417_s19, %s2911_s20  ;;  %p2920_p10 = scmp.lt.s32.totalorder %s2911_s20, %s2911_s20 }
  0xcc   : > { %p2914_p7 = pnand %p2912_p5, %p3344_p8  ;;  %p2921_p11 = por %p2920_p10, %p2919_p4 }
  0xce   : > { %p2915_p9 = pneg %p2914_p7 }
  0xd0   : > { %p2922_p12 = pnand %p2921_p11, %p2915_p9 }
  0xd2   : > { %2925 = shalt.err (!%p2922_p12)
}
  0xd3   : > { %2548 = dma.hbm_to_vmem [thread:$0]  (!%p3328_p6), %s3935_s4, 512, %s417_s19, [#allocation9], %s3201_s0, %s3201_s0, %s3202_s26  }
  0xd4   : > { %s2926_s29 = scalar_lea.hbm %s3937_s6, 16 }
  0xd5   : > { %p2927_p13 = scmp.ne.s32.totalorder %s3937_s6, %s2926_s29  ;;  %p2933_p3 = scmp.lt.u32.totalorder %s2926_s29, %s3937_s6 }
  0xd7   : > { %p2929_p0 = pnand %p2927_p13, %p3344_p8 }
  0xd9   : > { %p2930_p1 = pneg %p2929_p0 }
  0xdb   : > { %p2935_p2 = pnand %p2933_p3, %p2930_p1 }
  0xdd   : > { %2938 = shalt.err (!%p2935_p2)
}
  0xde   : > { %s2939_s14 = scalar_lea.vmem %s442_s28, 16  ;;  %s2946_s19 = scalar_lea.vmem %s442_s28, 32 }
  0xdf   : > { %p2940_p5 = scmp.ne.s32.totalorder %s442_s28, %s2939_s14  ;;  %p2947_p4 = scmp.lt.s32.totalorder %s442_s28, %s442_s28 }
  0xe0   : > { %p2948_p10 = scmp.lt.s32.totalorder %s2946_s19, %s2939_s14 }
  0xe1   : > { %p2942_p7 = pnand %p2940_p5, %p3344_p8 }
  0xe2   : > { %p2949_p11 = por %p2948_p10, %p2947_p4 }
  0xe3   : > { %p2943_p9 = pneg %p2942_p7 }
  0xe5   : > { %p2950_p12 = pnand %p2949_p11, %p2943_p9 }
  0xe7   : > { %2953 = shalt.err (!%p2950_p12)
}
  0xe8   : > { %2554 = dma.hbm_to_vmem [thread:$0]  (!%p3328_p6), %s3937_s6, 16, %s442_s28, [#allocation12]  }
  0xe9   : > { %s3205_s1 = smov [#allocation16]   ;;  %s3206_s25 = smov [#allocation19]  }
  0xea   : > { %s462_s3 = sshll.u32 %s3205_s1, 4  ;;  %s486_s18 = sshll.u32 %s3206_s25, 4  ;;  %s463_s3 = int_to_ptr.vmem [resolvable:$true] %s462_s3  ;;  %s487_s18 = int_to_ptr.vmem [resolvable:$true] %s486_s18 }
  0xeb   : > { %s2954_s17 = scalar_lea.hbm %s3939_s8, 512 }
  0xec   : > { %p2955_p13 = scmp.ne.s32.totalorder %s3939_s8, %s2954_s17  ;;  %p2961_p3 = scmp.lt.u32.totalorder %s2954_s17, %s3939_s8 }
  0xee   : > { %p2957_p0 = pnand %p2955_p13, %p3344_p8 }
  0xf0   : > { %p2958_p1 = pneg %p2957_p0 }
  0xf2   : > { %p2963_p2 = pnand %p2961_p3, %p2958_p1 }
  0xf4   : > { %2966 = shalt.err (!%p2963_p2)
}
  0xf5   : > { %s2967_s28 = scalar_lea.vmem %s463_s3, 512  ;;  %p2975_p4 = scmp.lt.s32.totalorder %s463_s3, %s463_s3 }
  0xf6   : > { %p2968_p5 = scmp.ne.s32.totalorder %s463_s3, %s2967_s28  ;;  %p2976_p10 = scmp.lt.s32.totalorder %s2967_s28, %s2967_s28 }
  0xf8   : > { %p2970_p7 = pnand %p2968_p5, %p3344_p8  ;;  %p2977_p11 = por %p2976_p10, %p2975_p4 }
  0xfa   : > { %p2971_p9 = pneg %p2970_p7 }
  0xfc   : > { %p2978_p12 = pnand %p2977_p11, %p2971_p9 }
  0xfe   : > { %2981 = shalt.err (!%p2978_p12)
}
  0xff   : > { %2560 = dma.hbm_to_vmem [thread:$0]  (!%p3328_p6), %s3939_s8, 512, %s463_s3, [#allocation15], %s3201_s0, %s3201_s0, %s3202_s26  }
 0x100   : > { %s2982_s29 = scalar_lea.hbm %s3941_s10, 1024 }
 0x101   : > { %p2983_p13 = scmp.ne.s32.totalorder %s3941_s10, %s2982_s29  ;;  %p2989_p3 = scmp.lt.u32.totalorder %s2982_s29, %s3941_s10 }
 0x103   : > { %p2985_p0 = pnand %p2983_p13, %p3344_p8 }
 0x105   : > { %p2986_p1 = pneg %p2985_p0 }
 0x107   : > { %p2991_p2 = pnand %p2989_p3, %p2986_p1 }
 0x109   : > { %2994 = shalt.err (!%p2991_p2)
}
 0x10a   : > { %s2995_s14 = scalar_lea.vmem %s487_s18, 1024  ;;  %p3003_p4 = scmp.lt.s32.totalorder %s487_s18, %s487_s18 }
 0x10b   : > { %p2996_p5 = scmp.ne.s32.totalorder %s487_s18, %s2995_s14  ;;  %p3004_p10 = scmp.lt.s32.totalorder %s2995_s14, %s2995_s14 }
 0x10d   : > { %p2998_p7 = pnand %p2996_p5, %p3344_p8  ;;  %p3005_p11 = por %p3004_p10, %p3003_p4 }
 0x10f   : > { %p2999_p9 = pneg %p2998_p7 }
 0x111   : > { %p3006_p12 = pnand %p3005_p11, %p2999_p9 }
 0x113   : > { %3009 = shalt.err (!%p3006_p12)
}
 0x114   : > { %2566 = dma.hbm_to_vmem [thread:$0]  (!%p3328_p6), %s3941_s10, 1024, %s487_s18, [#allocation18], %s3201_s0, %s3201_s0, %s3202_s26  }
 0x115   : > { %s3207_s28 = smov [#allocation22]   ;;  %s3208_s20 = smov [#allocation23]  }
 0x116   : > { %s511_s30 = sshll.u32 %s3207_s28, 4  ;;  %s522_s1 = sshll.u32 %s3208_s20, 4  ;;  %s512_s30 = int_to_ptr.vmem [resolvable:$true] %s511_s30  ;;  %s523_s1 = int_to_ptr.vmem [resolvable:$true] %s522_s1 }
 0x117   : > { %s3010_s27 = scalar_lea.hbm %s3943_s12, 16 }
 0x118   : > { %p3011_p13 = scmp.ne.s32.totalorder %s3943_s12, %s3010_s27  ;;  %p3017_p3 = scmp.lt.u32.totalorder %s3010_s27, %s3943_s12 }
 0x11a   : > { %p3013_p0 = pnand %p3011_p13, %p3344_p8 }
 0x11c   : > { %p3014_p1 = pneg %p3013_p0 }
 0x11e   : > { %p3019_p2 = pnand %p3017_p3, %p3014_p1 }
 0x120   : > { %3022 = shalt.err (!%p3019_p2)
}
 0x121   : > { %s3023_s0 = scalar_lea.vmem %s512_s30, 16  ;;  %s3030_s26 = scalar_lea.vmem %s512_s30, 32 }
 0x122   : > { %p3024_p5 = scmp.ne.s32.totalorder %s512_s30, %s3023_s0  ;;  %p3031_p4 = scmp.lt.s32.totalorder %s512_s30, %s512_s30 }
 0x123   : > { %p3032_p10 = scmp.lt.s32.totalorder %s3030_s26, %s3023_s0 }
 0x124   : > { %p3026_p7 = pnand %p3024_p5, %p3344_p8 }
 0x125   : > { %p3033_p11 = por %p3032_p10, %p3031_p4 }
 0x126   : > { %p3027_p9 = pneg %p3026_p7 }
 0x128   : > { %p3034_p12 = pnand %p3033_p11, %p3027_p9 }
 0x12a   : > { %3037 = shalt.err (!%p3034_p12)
}
 0x12b   : > { %2572 = dma.hbm_to_vmem [thread:$0]  (!%p3328_p6), %s3943_s12, 16, %s512_s30, [#allocation21]  }
 0x12c   : > { %s3038_s20 = scalar_lea.hbm %s3944_s13, 16 }
 0x12d   : > { %p3039_p13 = scmp.ne.s32.totalorder %s3944_s13, %s3038_s20  ;;  %p3045_p3 = scmp.lt.u32.totalorder %s3038_s20, %s3944_s13 }
 0x12f   : > { %p3041_p0 = pnand %p3039_p13, %p3344_p8 }
 0x131   : > { %p3042_p1 = pneg %p3041_p0 }
 0x133   : > { %p3047_p2 = pnand %p3045_p3, %p3042_p1 }
 0x135   : > { %3050 = shalt.err (!%p3047_p2)
}
 0x136   : > { %s3051_s24 = scalar_lea.vmem %s523_s1, 16  ;;  %s3058_s30 = scalar_lea.vmem %s523_s1, 32 }
 0x137   : > { %p3052_p5 = scmp.ne.s32.totalorder %s523_s1, %s3051_s24  ;;  %p3059_p4 = scmp.lt.s32.totalorder %s523_s1, %s523_s1 }
 0x138   : > { %p3060_p10 = scmp.lt.s32.totalorder %s3058_s30, %s3051_s24 }
 0x139   : > { %p3054_p7 = pnand %p3052_p5, %p3344_p8 }
 0x13a   : > { %p3061_p11 = por %p3060_p10, %p3059_p4 }
 0x13b   : > { %p3055_p9 = pneg %p3054_p7 }
 0x13d   : > { %p3062_p12 = pnand %p3061_p11, %p3055_p9 }
 0x13f   : > { %3065 = shalt.err (!%p3062_p12)
}
 0x140   : > { %s3969_s0 = sld [smem:[#allocation36_spill]]  ;;  %s3970_s21 = sld [smem:[#allocation35_spill]] }
 0x141   : > { %s3971_s26 = sld [smem:[#allocation37_spill]]  ;;  %s2220_s18 = sadd.s32 4294967294, %s3190_s16  }
 0x142   : > { %2575 = dma.hbm_to_vmem [thread:$0]  (!%p3328_p6), %s3944_s13, 16, %s523_s1, [#allocation24]  }
 0x143   : > { %s3607_s23 = sadd.s32 1, %s3190_s16   ;;  %s44_s3 = sadd.s32 1, %s3186_s15 }
 0x144   : > { %s41_s19 = ssub.s32 %s3190_s16, %s3607_s23  ;;  %p52_p0 = scmp.eq.s32.totalorder %s3190_s16, 0 }
 0x145   : > { %p42_p13 = scmp.eq.s32.totalorder %s41_s19, 0  ;;  %p360_p9 = scmp.eq.s32.totalorder %s2220_s18, 1 }
 0x146   : > { %p51_p8 = scmp.ne.s32.totalorder %s3186_s15, %s3969_s0  ;;  %p57_p1 = scmp.ne.s32.totalorder %s3969_s0, %s3970_s21 }
 0x147   : > { %p354_p3 = scmp.eq.s32.totalorder %s3971_s26, 1  ;;  %p3972_p5 = scmp.eq.s32.totalorder %s3971_s26, 0 }
 0x148   : > { %s3619_s28 = scalar_select %p42_p13, %s3186_s15, %s44_s3  }
 0x149   : > { %p53_p2 = por %p52_p0, %p51_p8  ;;  %p3623_p7 = por %p3972_p5, %p57_p1 }
 0x14a   : > { %p3627_p6 = por %p354_p3, %p51_p8  ;;  %p2597_p4 = scmp.lt.s32.totalorder %s3190_s16, 2 }
 0x14b   : > { %s533_s25 = sand.u32 1, %s3186_s15   ;;  %p3633_p10 = por %p360_p9, %p57_p1 }
 0x14c   : > { %s3974_s1 = scalar_select %p3627_p6, 1, 0 }
 0x14d   : > { %s3975_s29 = scalar_select %p3633_p10, 1, 0 }
 0x14e   : > { %s2236_s27 = sshll.u32 %s533_s25, 3  ;;  %s2237_s17 = sshll.u32 %s3190_s16, 7 }
 0x14f   : > { %s3976_s22 = sld [smem:[#allocation39_spill]]  ;;  %s537_s0 = scalar_lea.vmem [#allocation2], %s2236_s27 }
 0x150   : > { %s544_s21 = sshll.u32 %s537_s0, 4  ;;  %p3643_p11 = pnand %p2597_p4, %p53_p2  ;;  %s3647_s21 = int_to_ptr.vmem [resolvable:$true] %s544_s21 }
 0x151   : > { %s534_s18 = scalar_lea.sflag [#allocation3], %s533_s25 }
 0x152   : > { %p3068_p8 = pneg %p3643_p11 }
 0x155   : > { %s3641_s14 = scalar_lea.hbm %s3976_s22, %s2237_s17  ;;  %s3071_s17 = scalar_lea.hbm %s3976_s22, 256 }
 0x156   : > { %s3066_s3 = scalar_lea.hbm %s3641_s14, 128  ;;  %p3072_p1 = scmp.lt.u32.totalorder %s3641_s14, %s3976_s22 }
 0x157   : > { %p3067_p12 = scmp.ne.s32.totalorder %s3641_s14, %s3066_s3  ;;  %p3073_p3 = scmp.lt.u32.totalorder %s3071_s17, %s3066_s3 }
 0x158   : > { %p3075_p5 = scmp.lt.u32.totalorder %s3066_s3, %s3641_s14 }
 0x159   : > { %p3069_p13 = pnand %p3068_p8, %p3067_p12  ;;  %p3074_p2 = por %p3073_p3, %p3072_p1 }
 0x15b   : > { %p3070_p0 = pneg %p3069_p13  ;;  %p3076_p9 = por %p3075_p5, %p3074_p2 }
 0x15d   : > { %p3077_p4 = pnand %p3076_p9, %p3070_p0 }
 0x15f   : > { %3080 = shalt.err (!%p3077_p4)
}
 0x160   : > { %s3081_s25 = scalar_lea.vmem %s3647_s21, 128  ;;  %s3209_s0 = smov [#allocation2]  }
 0x161   : > { %p3082_p12 = scmp.ne.s32.totalorder %s3647_s21, %s3081_s25  ;;  %s3086_s19 = sshll.u32 %s3209_s0, 4  ;;  %s3087_s19 = int_to_ptr.vmem [resolvable:$false] %s3086_s19 }
 0x162   : > { %s3088_s27 = scalar_lea.vmem %s3087_s19, 256  ;;  %p3089_p6 = scmp.lt.s32.totalorder %s3647_s21, %s3087_s19 }
 0x163   : > { %p3084_p13 = pnand %p3082_p12, %p3068_p8  ;;  %p3090_p1 = scmp.lt.s32.totalorder %s3088_s27, %s3081_s25 }
 0x165   : > { %p3085_p10 = pneg %p3084_p13  ;;  %p3091_p3 = por %p3090_p1, %p3089_p6 }
 0x167   : > { %p3092_p2 = pnand %p3091_p3, %p3085_p10 }
 0x169   : > { %3095 = shalt.err (!%p3092_p2)
}
 0x16a   : > { %2579 = dma.hbm_to_vmem [thread:$0]  (!%p3643_p11), %s3641_s14, 128, %s3647_s21, %s534_s18  }
 0x16b   : > { %s3978_s3 = sld [smem:[#allocation38_spill]] }
 0x171   : > { %p3979_p0 = scmp.ne.s32.totalorder %s3978_s3, 0 }
 0x172   : > { %s3980_s17 = sld [smem:[#allocation36_spill]] (!%p3979_p0) }
 0x173   : > { %553 = sbr.rel (%p3979_p0) target bundleno = 2905 (0xb59), region = 76 }
 0x178   : > { %s3677_s24 = sand.u32 (!%p3979_p0), 1, %s3980_s17  }
 0x179   : > { %s2239_s30 = sshll.u32 (!%p3979_p0), %s3677_s24, 3  ;;  %s556_s25 = scalar_lea.sflag (!%p3979_p0), [#allocation3], %s3677_s24 }
 0x17a   : > { %s3683_s0 = scalar_lea.vmem [#allocation2], %s2239_s30 }
 0x17b   : > { %3141 = dma.done.wait (%p3623_p7), %s556_s25, 128  }
 0x17c   : > { %3143 = vsyncadd (%p3623_p7), %s556_s25, 4294967168  ;;  %s3981_s14 = sld [smem:[#allocation37_spill]] }
 0x182   : > { %p3982_p6 = scmp.eq.s32.totalorder %s3981_s14, 0 }
 0x184   : > { %3145 = dma.done.wait (%p3982_p6), [#allocation6], 640   ;;  %p3983_p10 = pmov %p3982_p6 }
 0x185   : > { %p3984_p11 = pmov %p3982_p6 }
 0x186   : > { %3147 = vsyncadd (%p3983_p10), [#allocation6], 4294966656 }
 0x187   : > { %3149 = dma.done.wait (%p3984_p11), [#allocation9], 528   ;;  %p3985_p8 = pmov %p3982_p6 }
 0x188   : > { %p3986_p5 = pmov %p3982_p6 }
 0x189   : > { %3151 = vsyncadd (%p3985_p8), [#allocation9], 4294966768 }
 0x18a   : > { %3153 = dma.done.wait (%p3986_p5), [#allocation12], 32   ;;  %p3987_p9 = pmov %p3986_p5 }
 0x18b   : > { %p3988_p7 = pmov %p3986_p5 }
 0x18c   : > { %3155 = vsyncadd (%p3987_p9), [#allocation12], 4294967264 }
 0x18d   : > { %3157 = dma.done.wait (%p3988_p7), [#allocation15], 528   ;;  %p3989_p4 = pmov %p3986_p5 }
 0x18f   : > { %3159 = vsyncadd (%p3989_p4), [#allocation15], 4294966768  ;;  %p3990_p12 = pmov %p3989_p4 }
 0x190   : > { %p3991_p13 = pmov %p3989_p4 }
 0x191   : > { %3161 = dma.done.wait (%p3990_p12), [#allocation18], 1040  }
 0x192   : > { %3163 = vsyncadd (%p3991_p13), [#allocation18], 4294966256  ;;  %p3992_p1 = pmov %p3989_p4 }
 0x194   : > { %3165 = dma.done.wait (%p3992_p1), [#allocation21], 32   ;;  %p3993_p3 = pmov %p3992_p1 }
 0x195   : > { %p3994_p2 = pmov %p3992_p1 }
 0x196   : > { %3167 = vsyncadd (%p3993_p3), [#allocation21], 4294967264 }
 0x197   : > { %3169 = dma.done.wait (%p3994_p2), [#allocation24], 16   ;;  %p3995_p0 = pmov %p3992_p1 }
 0x198   : > { %v3210_v0 = vmov 0.0|0.0   ;;  %vm3211_vm0 = vmmov 0   ;;  %v3212_v1 = vmov 0.0   ;;  %v657_v2 = vld [vmem:[#allocation7] sm:$0xff]  ;;  %v658_v3 = vld [vmem:[#allocation7 + $0x8] sm:$0xff]  ;;  %v659_v4 = vld [vmem:[#allocation7 + $0x10] sm:$0xff] }
 0x199   : > { %3171 = vsyncadd (%p3995_p0), [#allocation24], 4294967280  ;;  %2450 = vmatprep.subr.bf16.mxu1 %v3210_v0  ;;  %2352 = vmatprep.mubr.msk.f32.mxu1 %vm3211_vm0, %v3212_v1  ;;  %v2451_v5 = vpack.c.bf16 %v658_v3, %v657_v2  ;;  %v660_v6 = vld [vmem:[#allocation7 + $0x18] sm:$0xff]  ;;  %v3725_v8 = vld [vmem:[%s3683_s0] sm:$0xff]  ;;  %vm668_vm1 = vcmask 261120   ;;  %s3213_s20 = smov 96  }
 0x19a   : > { %2369 = vmatprep.subr.mxu0 %v3212_v1  ;;  %2371 = vmatprep.mubr.msk.f32.mxu0 %vm3211_vm0, %v3212_v1  ;;  %v2454_v7 = vpack.c.bf16 %v660_v6, %v659_v4  ;;  %v2254_v9 = vld [vmem:[#allocation8] ss:$0 sm:$0xff]  ;;  %v2256_v11 = vld [vmem:[#allocation5] ss:$0 sm:$0xff]  ;;  %v2257_v16 = vld [vmem:[#allocation5 + $0x1] ss:$0 sm:$0xff] }
 0x19b   : > { %2452 = vmatpush3.bf16.msra.mxu1 %v2451_v5  ;;  %v2258_v17 = vld [vmem:[#allocation5 + $0x2] ss:$0 sm:$0xff]  ;;  %v2259_v20 = vld [vmem:[#allocation5 + $0x3] ss:$0 sm:$0xff]  ;;  %v2260_v21 = vld [vmem:[#allocation5 + $0x4] ss:$0 sm:$0xff] }
 0x19c   : > { %2453 = vmatprep.subr.bf16.mxu1 %v3210_v0  ;;  %v2261_v24 = vld [vmem:[#allocation5 + $0x5] ss:$0 sm:$0xff]  ;;  %v2262_v25 = vld [vmem:[#allocation5 + $0x6] ss:$0 sm:$0xff]  ;;  %v2263_v28 = vld [vmem:[#allocation5 + $0x7] ss:$0 sm:$0xff] }
 0x19d   : > { %vm972_vm2 = vcmask 64512   ;;  %s3214_s21 = smov 64   ;;  %vm1907_vm3 = vcmask 523264   ;;  %s2292_s26 = sshll.u32 %s3981_s14, 7 }
 0x19e   : > { %s655_s18 = scalar_lea.vmem [#allocation25], %s2239_s30  ;;  %s3996_s17 = sld [smem:[#allocation42_spill]] }
 0x19f   : > { %2455 = vmatpush3.bf16.msra.mxu1 %v2454_v7  ;;  %s2026_s19 = sshll.u32 %s655_s18, 4  ;;  %s2013_s0 = scalar_lea.sflag [#allocation4], %s3677_s24  ;;  %s3888_s19 = int_to_ptr.vmem [resolvable:$true] %s2026_s19 }
 0x1a0   : > { %p3997_p10 = scmp.ne.s32.totalorder %s3974_s1, 0  ;;  %s3215_s30 = smov [#allocation25]  }
 0x1a1   : > { %s3100_s14 = sshll.u32 %s3215_s30, 4  ;;  %s3101_s14 = int_to_ptr.vmem [resolvable:$false] %s3100_s14 }
 0x1a2   : > { %2353 = vmatmul.mubr.msk.f32.vlgmr.msra.gmra.mrb[0].mxu1 %vm668_vm1, %v3725_v8  ;;  %p3103_p5 = scmp.lt.s32.totalorder %s3888_s19, %s3101_s14 }
 0x1a4   : > { %s3886_s25 = scalar_lea.hbm %s3996_s17, %s2292_s26 }
 0x275   : > { %v738_v10 = vpop.f32.mrb[0].mxu1 }
 0x276   : > { %v3729_v12 = vadd.f32 %v2254_v9, %v738_v10  ;;  %v2354_v13 = vpop.f32.mrb[1].mxu1 }
 0x278   : > { %839 = vrot.lane.b32.xlu0 %v3729_v12, %s3213_s20  ;;  %v798_v14 = vmul.f32 %v2256_v11, %v3729_v12  ;;  %v799_v18 = vmul.f32 %v2257_v16, %v3729_v12  ;;  %v800_v19 = vmul.f32 %v2258_v17, %v3729_v12  ;;  %v801_v22 = vmul.f32 %v2259_v20, %v3729_v12  ;;  %s3096_s20 = scalar_lea.vmem %s3888_s19, 128 }
 0x279   : > { %v802_v23 = vmul.f32 %v2260_v21, %v3729_v12  ;;  %v803_v26 = vmul.f32 %v2261_v24, %v3729_v12  ;;  %v804_v27 = vmul.f32 %v2262_v25, %v3729_v12  ;;  %v805_v29 = vmul.f32 %v2263_v28, %v3729_v12  ;;  %p3097_p6 = scmp.ne.s32.totalorder %s3888_s19, %s3096_s20 }
 0x27a   : > { %2357 = vmatprep.mubr.msk.f32.mxu1 %vm668_vm1, %v798_v14 }
 0x27b   : > { %p3098_p11 = pnand %p3097_p6, %p3997_p10 }
 0x27d   : > { %p3099_p8 = pneg %p3098_p11 }
 0x2ea   : > { %v840_v15 = vpop.permute.xlu0 %839 }
 0x2eb   : > { %2355 = vmatprep.subr.msk.mxu1 %vm668_vm1, %v840_v15 }
 0x2ec   : > { %2356 = vmatpush3.xpose.msk.msra.mxu1 %vm668_vm1, %v840_v15 }
 0x2ed   : > { %2384 = vmatprep.subr.mxu1 %v3212_v1 }
 0x2ef   : > { %2358 = vmatmul.mubr.msk.f32.vlgmr.msra.gmra.mrb[2].mxu1 %vm668_vm1, %v799_v18 }
 0x2f0   : > { %2360 = vmatprep.mubr.msk.f32.mxu1 %vm668_vm1, %v800_v19 }
 0x2f3   : > { %2361 = vmatmul.mubr.msk.f32.gmra.mrb[4].mxu1 %vm668_vm1, %v801_v22 }
 0x2f4   : > { %2363 = vmatprep.mubr.msk.f32.mxu1 %vm668_vm1, %v802_v23 }
 0x2f7   : > { %2364 = vmatmul.mubr.msk.f32.gmra.mrb[6].mxu1 %vm668_vm1, %v803_v26 }
 0x2f8   : > { %2366 = vmatprep.mubr.msk.f32.mxu1 %vm668_vm1, %v804_v27 }
 0x2fb   : > { %2367 = vmatmul.mubr.msk.f32.gmra.mrb[8].mxu1 %vm668_vm1, %v805_v29 }
 0x2fc   : > { %2386 = vmatprep.mubr.msk.f32.mxu1 %vm3211_vm0, %v3212_v1 }
 0x3c2   : > { %v2359_v30 = vpop.f32.mrb[2].mxu1 }
 0x3c3   : > { %v3753_v31 = vpop.f32.mrb[3].mxu1  ;;  %v976_v32 = vsel %vm972_vm2, %v2359_v30, -inf }
 0x3c4   : > { %977 = vmax.xlane.f32.xlu1 %v976_v32  ;;  %v973_v33 = vsel %vm972_vm2, %v3753_v31, -inf }
 0x3c5   : > { %974 = vmax.xlane.f32.xlu0 %v973_v33 }
 0x3c6   : > { %v3758_v34 = vpop.f32.mrb[4].mxu1 }
 0x3c7   : > { %v943_v35 = vpop.f32.mrb[5].mxu1  ;;  %v982_v40 = vsel %vm972_vm2, %v3758_v34, -inf }
 0x3c8   : > { %v979_v41 = vsel %vm972_vm2, %v943_v35, -inf }
 0x3ca   : > { %v3760_v36 = vpop.f32.mrb[6].mxu1 }
 0x3cb   : > { %v953_v37 = vpop.f32.mrb[7].mxu1  ;;  %v988_v42 = vsel %vm972_vm2, %v3760_v36, -inf }
 0x3cc   : > { %v985_v43 = vsel %vm972_vm2, %v953_v37, -inf }
 0x3ce   : > { %v3762_v38 = vpop.f32.mrb[8].mxu1 }
 0x3cf   : > { %v963_v39 = vpop.f32.mrb[9].mxu1  ;;  %v994_v44 = vsel %vm972_vm2, %v3762_v38, -inf }
 0x3d0   : > { %v991_v45 = vsel %vm972_vm2, %v963_v39, -inf }
 0x3d5   : > { %806 = vrot.lane.b32.xlu1 %v2256_v11, %s3214_s21 }
 0x3d9   : > { %810 = vrot.lane.b32.xlu1 %v2258_v17, %s3214_s21 }
 0x3db   : > { %808 = vrot.lane.b32.xlu0 %v2257_v16, %s3214_s21 }
 0x3dd   : > { %812 = vrot.lane.b32.xlu1 %v2259_v20, %s3214_s21 }
 0x3df   : > { %816 = vrot.lane.b32.xlu0 %v2261_v24, %s3214_s21 }
 0x3e3   : > { %820 = vrot.lane.b32.xlu0 %v2263_v28, %s3214_s21 }
 0x401   : > { %983 = vmax.xlane.f32.xlu1 %v982_v40 }
 0x405   : > { %980 = vmax.xlane.f32.xlu1 %v979_v41 }
 0x409   : > { %989 = vmax.xlane.f32.xlu1 %v988_v42 }
 0x40d   : > { %986 = vmax.xlane.f32.xlu1 %v985_v43 }
 0x411   : > { %995 = vmax.xlane.f32.xlu1 %v994_v44 }
 0x415   : > { %992 = vmax.xlane.f32.xlu1 %v991_v45 }
 0x426   : > { %814 = vrot.lane.b32.xlu1 %v2260_v21, %s3214_s21 }
 0x42a   : > { %818 = vrot.lane.b32.xlu1 %v2262_v25, %s3214_s21 }
 0x451   : > { %v978_v46 = vpop.xlane.xlu1 %977 }
 0x452   : > { %v975_v47 = vpop.xlane.xlu0 %974  ;;  %v998_v59 = vsub.f32 %v2359_v30, %v978_v46 }
 0x453   : > { %v997_v48 = vsub.f32 %v3753_v31, %v975_v47 }
 0x454   : > { %v1007_v60 = vmul.f32 1.442695, %v998_v59 }
 0x455   : > { %v807_v49 = vpop.permute.xlu1 %806  ;;  %v1005_v23 = vmul.f32 1.442695, %v997_v48 }
 0x456   : > { %v830_v50 = vmul.f32 %v807_v49, %v3729_v12  ;;  %v809_v51 = vpop.permute.xlu0 %808  ;;  %2666 = vpow2.f32 %v1007_v60 }
 0x457   : > { %v831_v52 = vmul.f32 %v809_v51, %v3729_v12 }
 0x458   : > { %1062 = vrot.lane.b32.xlu0 %v830_v50, %s3214_s21 }
 0x459   : > { %v811_v53 = vpop.permute.xlu1 %810  ;;  %1139 = vrot.lane.b32.xlu1 %v831_v52, %s3214_s21 }
 0x45a   : > { %v832_v54 = vmul.f32 %v811_v53, %v3729_v12  ;;  %v817_v57 = vpop.permute.xlu0 %816 }
 0x45b   : > { %v835_v58 = vmul.f32 %v817_v57, %v3729_v12 }
 0x45d   : > { %v813_v55 = vpop.permute.xlu1 %812  ;;  %1216 = vrot.lane.b32.xlu1 %v832_v54, %s3214_s21 }
 0x45e   : > { %v833_v56 = vmul.f32 %v813_v55, %v3729_v12  ;;  %v821_v29 = vpop.permute.xlu0 %820 }
 0x45f   : > { %v837_v30 = vmul.f32 %v821_v29, %v3729_v12 }
 0x460   : > { %1293 = vrot.lane.b32.xlu0 %v833_v56, %s3214_s21  ;;  %v3792_v61 = vpop.eup %2666 }
 0x461   : > { %v1024_v62 = vsel %vm972_vm2, %v3792_v61, 0.0 }
 0x464   : > { %1447 = vrot.lane.b32.xlu0 %v835_v58, %s3214_s21 }
 0x483   : > { %1025 = vadd.xlane.f32.xlu0 %v1024_v62 }
 0x48e   : > { %v984_v63 = vpop.xlane.xlu1 %983 }
 0x48f   : > { %v1000_v24 = vsub.f32 %v3758_v34, %v984_v63 }
 0x491   : > { %v1011_v25 = vmul.f32 1.442695, %v1000_v24 }
 0x492   : > { %v981_v2 = vpop.xlane.xlu1 %980 }
 0x493   : > { %v999_v3 = vsub.f32 %v943_v35, %v981_v2 }
 0x495   : > { %v1009_v4 = vmul.f32 1.442695, %v999_v3 }
 0x496   : > { %v990_v5 = vpop.xlane.xlu1 %989 }
 0x497   : > { %2668 = vpow2.f32 %v1009_v4  ;;  %v1002_v26 = vsub.f32 %v3760_v36, %v990_v5 }
 0x499   : > { %v1015_v27 = vmul.f32 1.442695, %v1002_v26 }
 0x49a   : > { %v987_v6 = vpop.xlane.xlu1 %986 }
 0x49b   : > { %v1001_v7 = vsub.f32 %v953_v37, %v987_v6 }
 0x49d   : > { %v1013_v9 = vmul.f32 1.442695, %v1001_v7 }
 0x49e   : > { %v996_v10 = vpop.xlane.xlu1 %995 }
 0x49f   : > { %2670 = vpow2.f32 %v1013_v9  ;;  %v1004_v28 = vsub.f32 %v3762_v38, %v996_v10 }
 0x4a1   : > { %v3796_v11 = vpop.eup %2668  ;;  %v1019_v31 = vmul.f32 1.442695, %v1004_v28 }
 0x4a2   : > { %v993_v13 = vpop.xlane.xlu1 %992  ;;  %v1027_v14 = vsel %vm972_vm2, %v3796_v11, 0.0 }
 0x4a3   : > { %v1003_v15 = vsub.f32 %v963_v39, %v993_v13  ;;  %1028 = vadd.xlane.f32.xlu0 %v1027_v14  ;;  %v1692_v13 = vld [vmem:[#allocation10] sm:$0xff]  ;;  %v1693_v14 = vld [vmem:[#allocation10 + $0x8] sm:$0xff] }
 0x4a5   : > { %v1017_v16 = vmul.f32 1.442695, %v1003_v15  ;;  %v2457_v15 = vpack.c.bf16 %v1693_v14, %v1692_v13 }
 0x4a6   : > { %v815_v17 = vpop.permute.xlu1 %814 }
 0x4a7   : > { %2672 = vpow2.f32 %v1017_v16  ;;  %v834_v18 = vmul.f32 %v815_v17, %v3729_v12  ;;  %v1694_v16 = vld [vmem:[#allocation10 + $0x10] sm:$0xff]  ;;  %v1695_v17 = vld [vmem:[#allocation10 + $0x18] sm:$0xff] }
 0x4a8   : > { %2674 = vpow2.f32 %v1005_v23 }
 0x4a9   : > { %v3801_v19 = vpop.eup %2670  ;;  %1370 = vrot.lane.b32.xlu1 %v834_v18, %s3214_s21  ;;  %2676 = vpow2.f32 %v1011_v25  ;;  %v2460_v18 = vpack.c.bf16 %v1695_v17, %v1694_v16  ;;  %v2283_v17 = vld [vmem:[#allocation13] ss:$0 sm:$0xff] }
 0x4aa   : > { %v1033_v20 = vsel %vm972_vm2, %v3801_v19, 0.0  ;;  %2678 = vpow2.f32 %v1015_v27  ;;  %v819_v42 = vpop.permute.xlu1 %818 }
 0x4ab   : > { %1034 = vadd.xlane.f32.xlu0 %v1033_v20  ;;  %2680 = vpow2.f32 %v1019_v31  ;;  %v836_v43 = vmul.f32 %v819_v42, %v3729_v12 }
 0x4b1   : > { %v3806_v21 = vpop.eup %2672 }
 0x4b2   : > { %v1039_v22 = vsel %vm972_vm2, %v3806_v21, 0.0  ;;  %v2675_v32 = vpop.eup %2674 }
 0x4b3   : > { %1040 = vadd.xlane.f32.xlu0 %v1039_v22  ;;  %v1021_v34 = vsel %vm972_vm2, %v2675_v32, 0.0  ;;  %v2677_v35 = vpop.eup %2676 }
 0x4b4   : > { %v1030_v36 = vsel %vm972_vm2, %v2677_v35, 0.0  ;;  %v2679_v37 = vpop.eup %2678 }
 0x4b5   : > { %v1036_v39 = vsel %vm972_vm2, %v2679_v37, 0.0  ;;  %v2681_v40 = vpop.eup %2680 }
 0x4b6   : > { %v1042_v41 = vsel %vm972_vm2, %v2681_v40, 0.0 }
 0x4c9   : > { %1601 = vrot.lane.b32.xlu0 %v837_v30, %s3214_s21 }
 0x4ca   : > { %v1063_v33 = vpop.permute.xlu0 %1062 }
 0x4cb   : > { %2370 = vmatpush3.msra.mxu0 %v1063_v33  ;;  %v1140_v44 = vpop.permute.xlu1 %1139 }
 0x4cc   : > { %2374 = vmatprep.subr.mxu0 %v3212_v1 }
 0x4cd   : > { %1022 = vadd.xlane.f32.xlu1 %v1021_v34 }
 0x4cf   : > { %v1217_v45 = vpop.permute.xlu1 %1216 }
 0x4d1   : > { %1031 = vadd.xlane.f32.xlu1 %v1030_v36 }
 0x4d2   : > { %v1294_v38 = vpop.permute.xlu0 %1293 }
 0x4d3   : > { %2385 = vmatpush3.msra.mxu1 %v1294_v38 }
 0x4d4   : > { %2394 = vmatprep.subr.mxu1 %v3212_v1 }
 0x4d5   : > { %1037 = vadd.xlane.f32.xlu1 %v1036_v39 }
 0x4d6   : > { %v1448_v46 = vpop.permute.xlu0 %1447 }
 0x4d9   : > { %1043 = vadd.xlane.f32.xlu1 %v1042_v41 }
 0x4ea   : > { %1524 = vrot.lane.b32.xlu1 %v836_v43, %s3214_s21  ;;  %s3102_s21 = scalar_lea.vmem %s3101_s14, 256 }
 0x4eb   : > { %p3104_p9 = scmp.lt.s32.totalorder %s3102_s21, %s3096_s20 }
 0x4ed   : > { %p3105_p7 = por %p3104_p9, %p3103_p5 }
 0x4ef   : > { %p3106_p4 = pnand %p3105_p7, %p3099_p8 }
 0x510   : > { %v1026_v48 = vpop.xlane.xlu0 %1025 }
 0x51b   : > { %v1371_v47 = vpop.permute.xlu1 %1370 }
 0x530   : > { %v1029_v50 = vpop.xlane.xlu0 %1028 }
 0x538   : > { %v1035_v52 = vpop.xlane.xlu0 %1034 }
 0x540   : > { %v1041_v12 = vpop.xlane.xlu0 %1040 }
 0x544   : > { %v1602_v4 = vpop.permute.xlu0 %1601 }
 0x55a   : > { %v1023_v49 = vpop.xlane.xlu1 %1022 }
 0x55b   : > { %2682 = vrcp.f32 %v1023_v49 }
 0x55c   : > { %2684 = vrcp.f32 %v1026_v48 }
 0x55e   : > { %v1032_v51 = vpop.xlane.xlu1 %1031 }
 0x55f   : > { %2686 = vrcp.f32 %v1032_v51 }
 0x560   : > { %2688 = vrcp.f32 %v1029_v50  ;;  %v2281_v50 = vld [vmem:[#allocation11] ss:$0 sm:$0xff] }
 0x562   : > { %v1038_v53 = vpop.xlane.xlu1 %1037 }
 0x563   : > { %2690 = vrcp.f32 %v1038_v53 }
 0x564   : > { %2692 = vrcp.f32 %v1035_v52 }
 0x565   : > { %v2683_v54 = vpop.eup %2682 }
 0x566   : > { %v1044_v55 = vpop.xlane.xlu1 %1043  ;;  %v1053_v56 = vmul.f32 %v2683_v54, %v2675_v32  ;;  %v2685_v57 = vpop.eup %2684 }
 0x567   : > { %2694 = vrcp.f32 %v1044_v55  ;;  %v1054_v59 = vmul.f32 %v2685_v57, %v3792_v61 }
 0x568   : > { %2372 = vmatmul.mubr.msk.f32.vlgmr.msra.gmra.mrb[0].mxu0 %vm972_vm2, %v1053_v56  ;;  %2696 = vrcp.f32 %v1041_v12 }
 0x569   : > { %v2687_v58 = vpop.eup %2686  ;;  %2375 = vmatpush3.msra.mxu0 %v1140_v44  ;;  %2376 = vmatprep.mubr.msk.f32.mxu0 %vm3211_vm0, %v3212_v1 }
 0x56a   : > { %v1056_v60 = vmul.f32 %v2687_v58, %v2677_v35  ;;  %2379 = vmatprep.subr.mxu0 %v3212_v1  ;;  %v2689_v62 = vpop.eup %2688  ;;  %v1525_v10 = vpop.permute.xlu1 %1524 }
 0x56b   : > { %v1055_v2 = vmul.f32 %v2689_v62, %v3796_v11  ;;  %v1808_v62 = vld [vmem:[#allocation16 + $0x8] sm:$0xff] }
 0x56c   : > { %2377 = vmatmul.mubr.msk.f32.vlgmr.msra.gmra.mrb[2].mxu0 %vm972_vm2, %v1054_v59  ;;  %2387 = vmatmul.mubr.msk.f32.vlgmr.msra.gmra.mrb[10].mxu1 %vm972_vm2, %v1056_v60  ;;  %v1807_v60 = vld [vmem:[#allocation16] sm:$0xff] }
 0x56d   : > { %v2691_v63 = vpop.eup %2690  ;;  %2380 = vmatpush3.msra.mxu0 %v1217_v45  ;;  %2395 = vmatpush3.msra.mxu1 %v1448_v46 }
 0x56e   : > { %v1058_v3 = vmul.f32 %v2691_v63, %v2679_v37  ;;  %2381 = vmatprep.mubr.msk.f32.mxu0 %vm3211_vm0, %v3212_v1  ;;  %2389 = vmatprep.subr.mxu0 %v3212_v1  ;;  %v2693_v61 = vpop.eup %2692  ;;  %v2463_v63 = vpack.c.bf16 %v1808_v62, %v1807_v60 }
 0x56f   : > { %2396 = vmatprep.mubr.msk.f32.mxu1 %vm3211_vm0, %v3212_v1  ;;  %2404 = vmatprep.subr.mxu1 %v3212_v1  ;;  %v1057_v6 = vmul.f32 %v2693_v61, %v3801_v19  ;;  %v1893_v61 = vld [vmem:[#allocation19 + $0x8] sm:$0xff] }
 0x570   : > { %2382 = vmatmul.mubr.msk.f32.vlgmr.msra.gmra.mrb[4].mxu0 %vm972_vm2, %v1055_v2  ;;  %2397 = vmatmul.mubr.msk.f32.vlgmr.msra.gmra.mrb[12].mxu1 %vm972_vm2, %v1058_v3  ;;  %v1810_v2 = vld [vmem:[#allocation16 + $0x18] sm:$0xff] }
 0x571   : > { %v2695_v5 = vpop.eup %2694  ;;  %2390 = vmatpush3.msra.mxu0 %v1371_v47  ;;  %2405 = vmatpush3.msra.mxu1 %v1602_v4  ;;  %v1894_v4 = vld [vmem:[#allocation19 + $0x10] sm:$0xff] }
 0x572   : > { %v1060_v7 = vmul.f32 %v2695_v5, %v2681_v40  ;;  %2391 = vmatprep.mubr.msk.f32.mxu0 %vm3211_vm0, %v3212_v1  ;;  %2399 = vmatprep.subr.mxu0 %v3212_v1  ;;  %v2697_v9 = vpop.eup %2696 }
 0x573   : > { %2406 = vmatprep.mubr.msk.f32.mxu1 %vm3211_vm0, %v3212_v1  ;;  %2462 = vmatprep.subr.bf16.mxu1 %v3210_v0  ;;  %v1059_v11 = vmul.f32 %v2697_v9, %v3806_v21  ;;  %v1896_v9 = vld [vmem:[#allocation19 + $0x20] sm:$0xff] }
 0x574   : > { %2392 = vmatmul.mubr.msk.f32.vlgmr.msra.gmra.mrb[6].mxu0 %vm972_vm2, %v1057_v6  ;;  %2407 = vmatmul.mubr.msk.f32.vlgmr.msra.gmra.mrb[14].mxu1 %vm972_vm2, %v1060_v7  ;;  %v1895_v6 = vld [vmem:[#allocation19 + $0x18] sm:$0xff] }
 0x575   : > { %2400 = vmatpush3.msra.mxu0 %v1525_v10  ;;  %2401 = vmatprep.mubr.msk.f32.mxu0 %vm3211_vm0, %v3212_v1  ;;  %v2472_v7 = vpack.c.bf16 %v1895_v6, %v1894_v4  ;;  %v1897_v10 = vld [vmem:[#allocation19 + $0x28] sm:$0xff] }
 0x576   : > { %2456 = vmatprep.subr.bf16.mxu0 %v3210_v0  ;;  %2428 = vmatprep.mubr.msk.f32.mxu1 %vm3211_vm0, %v3212_v1 }
 0x577   : > { %2464 = vmatpush3.bf16.msra.mxu1 %v2463_v63 }
 0x578   : > { %2402 = vmatmul.mubr.msk.f32.vlgmr.msra.gmra.mrb[8].mxu0 %vm972_vm2, %v1059_v11  ;;  %2465 = vmatprep.subr.bf16.mxu1 %v3210_v0  ;;  %v2475_v11 = vpack.c.bf16 %v1897_v10, %v1896_v9 }
 0x579   : > { %2417 = vmatprep.mubr.msk.f32.mxu0 %vm3211_vm0, %v3212_v1  ;;  %2458 = vmatpush3.bf16.msra.mxu0 %v2457_v15 }
 0x57a   : > { %2459 = vmatprep.subr.bf16.mxu0 %v3210_v0 }
 0x57d   : > { %2461 = vmatpush3.bf16.msra.mxu0 %v2460_v18 }
 0x57e   : > { %2468 = vmatprep.subr.bf16.mxu0 %v3210_v0 }
 0x63b   : > { %v1134_v19 = vpop.f32.mrb[0].mxu0 }
 0x63c   : > { %v2373_v20 = vpop.f32.mrb[1].mxu0  ;;  %v1677_v23 = vsel %vm668_vm1, %v1134_v19, 0.0  ;;  %v2284_v19 = vld [vmem:[#allocation14] ss:$0 sm:$0xff] }
 0x63f   : > { %v1211_v21 = vpop.f32.mrb[2].mxu0  ;;  %v1365_v22 = vpop.f32.mrb[10].mxu1 }
 0x640   : > { %v1678_v24 = vsel %vm668_vm1, %v1211_v21, 0.0  ;;  %v2378_v25 = vpop.f32.mrb[3].mxu0  ;;  %v2388_v26 = vpop.f32.mrb[11].mxu1  ;;  %v1682_v34 = vsel %vm668_vm1, %v1365_v22, 0.0  ;;  %v1898_v22 = vld [vmem:[#allocation19 + $0x30] sm:$0xff] }
 0x641   : > { %v1679_v27 = vadd.f32 %v1678_v24, %v1677_v23  ;;  %v1899_v23 = vld [vmem:[#allocation19 + $0x38] sm:$0xff] }
 0x642   : > { %v2478_v24 = vpack.c.bf16 %v1899_v23, %v1898_v22  ;;  %v2285_v25 = vld [vmem:[#allocation17] ss:$0 sm:$0xff] }
 0x643   : > { %v1288_v28 = vpop.f32.mrb[4].mxu0  ;;  %v1519_v29 = vpop.f32.mrb[12].mxu1 }
 0x644   : > { %v1680_v30 = vsel %vm668_vm1, %v1288_v28, 0.0  ;;  %v2383_v31 = vpop.f32.mrb[5].mxu0  ;;  %v2398_v32 = vpop.f32.mrb[13].mxu1  ;;  %v1686_v42 = vsel %vm668_vm1, %v1519_v29, 0.0  ;;  %v2287_v29 = vld [vmem:[#allocation20] ss:$0 sm:$0xff] }
 0x645   : > { %v1681_v33 = vadd.f32 %v1680_v30, %v1679_v27 }
 0x647   : > { %v1442_v35 = vpop.f32.mrb[6].mxu0  ;;  %v1683_v36 = vadd.f32 %v1682_v34, %v1681_v33  ;;  %v1673_v37 = vpop.f32.mrb[14].mxu1 }
 0x648   : > { %v1684_v38 = vsel %vm668_vm1, %v1442_v35, 0.0  ;;  %v2393_v39 = vpop.f32.mrb[7].mxu0  ;;  %v2408_v40 = vpop.f32.mrb[15].mxu1  ;;  %v1690_v48 = vsel %vm668_vm1, %v1673_v37, 0.0 }
 0x649   : > { %v1685_v41 = vadd.f32 %v1684_v38, %v1683_v36 }
 0x64b   : > { %v1596_v43 = vpop.f32.mrb[8].mxu0  ;;  %v1687_v44 = vadd.f32 %v1686_v42, %v1685_v41 }
 0x64c   : > { %v1688_v45 = vsel %vm668_vm1, %v1596_v43, 0.0  ;;  %v2403_v46 = vpop.f32.mrb[9].mxu0 }
 0x64d   : > { %v1689_v47 = vadd.f32 %v1688_v45, %v1687_v44  ;;  %v2289_v44 = vld [vmem:[#allocation22] ss:$0 sm:$0xff]  ;;  %v2290_v46 = vld [vmem:[#allocation23] ss:$0 sm:$0xff] }
 0x64f   : > { %v1691_v49 = vadd.f32 %v1690_v48, %v1689_v47 }
 0x651   : > { %2418 = vmatmul.mubr.msk.f32.vlgmr.msra.gmra.mrb[10].mxu0 %vm668_vm1, %v1691_v49 }
 0x652   : > { %2447 = vmatprep.mubr.msk.f32.mxu0 %vm3211_vm0, %v3212_v1  ;;  %v1809_v1 = vld [vmem:[#allocation16 + $0x10] sm:$0xff] }
 0x653   : > { %v2466_v3 = vpack.c.bf16 %v1810_v2, %v1809_v1 }
 0x655   : > { %2467 = vmatpush3.bf16.msra.mxu1 %v2466_v3 }
 0x724   : > { %v1772_v51 = vpop.f32.mrb[10].mxu0 }
 0x725   : > { %v1773_v52 = vadd.f32 %v2281_v50, %v1772_v51  ;;  %v2419_v53 = vpop.f32.mrb[11].mxu0 }
 0x727   : > { %v1776_v54 = vadd.f32 %v1773_v52, %v3725_v8  ;;  %v1892_v8 = vld [vmem:[#allocation19] sm:$0xff] }
 0x728   : > { %v2469_v5 = vpack.c.bf16 %v1893_v61, %v1892_v8 }
 0x729   : > { %v1779_v12 = vsel %vm668_vm1, %v1776_v54, 0.0 }
 0x72a   : > { %1780 = vadd.xlane.f32.xlu1 %v1779_v12  ;;  %2470 = vmatpush3.bf16.msra.mxu0 %v2469_v5 }
 0x72b   : > { %2471 = vmatprep.subr.bf16.mxu0 %v3210_v0 }
 0x72e   : > { %2473 = vmatpush3.bf16.msra.mxu0 %v2472_v7 }
 0x72f   : > { %2474 = vmatprep.subr.bf16.mxu0 %v3210_v0 }
 0x732   : > { %2476 = vmatpush3.bf16.msra.mxu0 %v2475_v11 }
 0x733   : > { %2477 = vmatprep.subr.bf16.mxu0 %v3210_v0 }
 0x736   : > { %2479 = vmatpush3.bf16.msra.mxu0 %v2478_v24 }
 0x7b7   : > { %v1781_v55 = vpop.xlane.xlu1 %1780 }
 0x7b8   : > { %v1783_v56 = vmul.f32 0.03125, %v1781_v55 }
 0x7ba   : > { %v1784_v57 = vsub.f32 %v1776_v54, %v1783_v56 }
 0x7bc   : > { %v1785_v58 = vmul.f32 %v1784_v57, %v1784_v57 }
 0x7be   : > { %v1786_v59 = vsel %vm668_vm1, %v1785_v58, 0.0 }
 0x7bf   : > { %1787 = vadd.xlane.f32.xlu0 %v1786_v59 }
 0x84c   : > { %v1788_v13 = vpop.xlane.xlu0 %1787 }
 0x84d   : > { %v1789_v14 = vmul.f32 0.03125, %v1788_v13 }
 0x84f   : > { %v1790_v15 = vadd.f32 1e-05, %v1789_v14 }
 0x851   : > { %2698 = vrsqrt.f32 %v1790_v15 }
 0x85b   : > { %v2699_v16 = vpop.eup %2698 }
 0x85c   : > { %v1792_v18 = vmul.f32 %v2699_v16, %v1784_v57 }
 0x85e   : > { %v1799_v20 = vmul.f32 %v2283_v17, %v1792_v18 }
 0x860   : > { %v1806_v21 = vadd.f32 %v2284_v19, %v1799_v20 }
 0x862   : > { %2429 = vmatmul.mubr.msk.f32.vlgmr.msra.gmra.mrb[16].mxu1 %vm668_vm1, %v1806_v21 }
 0x935   : > { %v1887_v26 = vpop.f32.mrb[16].mxu1 }
 0x936   : > { %v1888_v27 = vadd.f32 %v2285_v25, %v1887_v26  ;;  %v2430_v0 = vpop.f32.mrb[17].mxu1 }
 0x938   : > { %v1891_v28 = vmax.f32 %v1888_v27, 0.0 }
 0x93a   : > { %2448 = vmatmul.mubr.msk.f32.vlgmr.msra.gmra.mrb[12].mxu0 %vm1907_vm3, %v1891_v28 }
 0xa0d   : > { %v1977_v30 = vpop.f32.mrb[12].mxu0 }
 0xa0e   : > { %v1978_v31 = vadd.f32 %v2287_v29, %v1977_v30  ;;  %v2449_v32 = vpop.f32.mrb[13].mxu0 }
 0xa10   : > { %v1981_v33 = vadd.f32 %v1978_v31, %v1806_v21 }
 0xa12   : > { %v1984_v34 = vsel %vm668_vm1, %v1981_v33, 0.0 }
 0xa13   : > { %1985 = vadd.xlane.f32.xlu0 %v1984_v34 }
 0xaa0   : > { %v1986_v35 = vpop.xlane.xlu0 %1985 }
 0xaa1   : > { %v1987_v36 = vmul.f32 0.03125, %v1986_v35 }
 0xaa3   : > { %v1988_v37 = vsub.f32 %v1981_v33, %v1987_v36 }
 0xaa5   : > { %v1989_v38 = vmul.f32 %v1988_v37, %v1988_v37 }
 0xaa7   : > { %v1990_v39 = vsel %vm668_vm1, %v1989_v38, 0.0 }
 0xaa8   : > { %1991 = vadd.xlane.f32.xlu1 %v1990_v39 }
 0xb35   : > { %v1992_v40 = vpop.xlane.xlu1 %1991 }
 0xb36   : > { %v1993_v41 = vmul.f32 0.03125, %v1992_v40 }
 0xb38   : > { %v1994_v42 = vadd.f32 1e-05, %v1993_v41 }
 0xb3a   : > { %2700 = vrsqrt.f32 %v1994_v42 }
 0xb44   : > { %v2701_v43 = vpop.eup %2700 }
 0xb45   : > { %v1996_v45 = vmul.f32 %v2701_v43, %v1988_v37 }
 0xb47   : > { %v2003_v47 = vmul.f32 %v2289_v44, %v1996_v45 }
 0xb49   : > { %v2010_v48 = vadd.f32 %v2290_v46, %v2003_v47 }
 0xb4b   : > { %2011 = vst.msk [vmem:[%s655_s18] sm:$0xff] %vm668_vm1, %v2010_v48 }
 0xb4c   : > { %3109 = shalt.err (!%p3106_p4)
}
 0xb4d   : > { %s3110_s24 = scalar_lea.hbm %s3886_s25, 128  ;;  %s3114_s27 = scalar_lea.hbm %s3996_s17, 256 }
 0xb4e   : > { %p3111_p12 = scmp.ne.s32.totalorder %s3886_s25, %s3110_s24  ;;  %p3115_p3 = scmp.lt.u32.totalorder %s3886_s25, %s3996_s17 }
 0xb4f   : > { %p3116_p2 = scmp.lt.u32.totalorder %s3114_s27, %s3110_s24  ;;  %p3118_p6 = scmp.lt.u32.totalorder %s3110_s24, %s3886_s25 }
 0xb50   : > { %p3112_p13 = pnand %p3111_p12, %p3997_p10 }
 0xb51   : > { %p3117_p0 = por %p3116_p2, %p3115_p3 }
 0xb52   : > { %p3113_p1 = pneg %p3112_p13 }
 0xb53   : > { %p3119_p11 = por %p3118_p6, %p3117_p0 }
 0xb55   : > { %p3120_p8 = pnand %p3119_p11, %p3113_p1 }
 0xb57   : > { %3123 = shalt.err (!%p3120_p8)
}
 0xb58   : > { %2534 = dma.vmem_to_hbm [thread:$0]  (%p3997_p10), %s3888_s19, 128, %s3886_s25, %s2013_s0  }
 0xb59 PF: > { %s3998_s20 = sld [smem:[#allocation35_spill]]  ;;  %p3999_p5 = scmp.ne.s32.totalorder %s3975_s29, 0 }
 0xb5a   : > { %p4000_p9 = scmp.ge.s32.totalorder %s3190_s16, 2 }
 0xb5c   : > { %p2581_p7 = pnand %p4000_p9, %p3999_p5 }
 0xb5f   : > { %s2038_s14 = sand.u32 1, %s3998_s20  }
 0xb60   : > { %s2039_s21 = scalar_lea.sflag [#allocation4], %s2038_s14 }
 0xb61   : > { %3173 = dma.done.wait (!%p2581_p7), %s2039_s21, 128  }
 0xb62   : > { %3175 = vsyncadd (!%p2581_p7), %s2039_s21, 4294967168  ;;  %s4001_s29 = sld [smem:[#allocation36_spill]]  ;;  %p34_p4 = scmp.ge.s32.totalorder %s3607_s23, 4  }
 0xb63   : > { %s4002_s30 = smov %s3186_s15  ;;  %s4003_s15 = smov %s3619_s28 }
 0xb64   : > { %s4004_s16 = smov %s3607_s23  ;;  %36 = sbr.rel (!%p34_p4) target bundleno = 17 (0x11), region = 173 }
 0xb6b   :  { %2044 = vsyncpa [#allocation3], 1 }
 0xb6c   :  { %2046 = vsyncpa [#allocation3 + $0x1], 1 }
 0xb6d   :  { %2047 = vsyncpa [#allocation6], 1 }
 0xb6e   :  { %2048 = vsyncpa [#allocation9], 1 }
 0xb6f   :  { %2049 = vsyncpa [#allocation12], 1 }
 0xb70   :  { %2050 = vsyncpa [#allocation15], 1 }
 0xb71   :  { %2051 = vsyncpa [#allocation18], 1 }
 0xb72   :  { %2052 = vsyncpa [#allocation21], 1 }
 0xb73   :  { %2053 = vsyncpa [#allocation24], 1 }
 0xb74   :  { %2054 = vsyncpa [#allocation4], 1 }
 0xb75   :  { %2056 = vsyncpa [#allocation4 + $0x1], 1 }

</bundles_post_ra>
